<compile_context>
chip_gen: v7x
topology: tpu7x:2x2x1
jax: 0.10.0
libtpu: 0.0.40
codegen_flags: <defaults>
</compile_context>

<pallas_src>
import functools

import jax
import jax.numpy as jnp
from jax import lax
from jax.experimental import pallas as pl
from jax.experimental.pallas import tpu as pltpu

EPS = 1e-5


# --------------------- fused 2x2-tap conv (+bias, +LN stats) ----------------
#
#   out[n, i, j] = bias + sum_{da,db in {0,1}} in[n, i+da+row_off, j+db+col_off] @ V[da*2+db]
# with zero padding for out-of-range rows/cols.  row_off = 0 / pad right-bottom
# for the transposed conv; row_off = -1 / pad left-top for the stride-2 conv on
# the super-pixel layout.  Also accumulates per-sample sum / sumsq of the conv
# output (LayerNorm statistics) into a resident stats block.

def _conv2x2_kernel(x_ref, v_ref, b_ref, y_ref, st_ref, *,
                    w_out, h_in, row_off, pad_left):
    i = pl.program_id(1)
    da = pl.program_id(2)

    @pl.when(jnp.logical_and(i == 0, da == 0))
    def _init_stats():
        st_ref[...] = jnp.zeros_like(st_ref)

    @pl.when(da == 0)
    def _init_row():
        # bias-initialize the resident output row
        y_ref[0, 0] = jnp.broadcast_to(b_ref[...], (w_out, b_ref.shape[-1]))

    r = i + da + row_off
    valid = jnp.logical_and(r >= 0, r <= h_in - 1)

    @pl.when(valid)
    def _accumulate():
        row = x_ref[0, 0]                                    # (W, Cin)
        zcol = jnp.zeros((1, row.shape[-1]), row.dtype)
        if pad_left:                                         # zero col on the left
            rowp = jnp.concatenate([zcol, row], axis=0)      # (W+1, Cin)
        else:                                                # zero col on the right
            rowp = jnp.concatenate([row, zcol], axis=0)
        c0 = jnp.dot(rowp[0:w_out, :], v_ref[2 * da],
                     preferred_element_type=jnp.float32)
        c1 = jnp.dot(rowp[1:w_out + 1, :], v_ref[2 * da + 1],
                     preferred_element_type=jnp.float32)
        y_ref[0, 0] = y_ref[0, 0] + c0 + c1

    @pl.when(da == 1)
    def _stats():
        yrow = y_ref[0, 0]
        s = jnp.sum(yrow)
        s2 = jnp.sum(yrow * yrow)
        rows = lax.broadcasted_iota(jnp.int32, (2, 128), 0)
        st_ref[0] = st_ref[0] + jnp.where(rows == 0, s, s2)


def conv2x2_ln_stats(x, v, bias, *, row_off, pad_left):
    """Fused 2x2-tap conv + bias on channels-last x; returns (out, LN stats)."""
    N, H, W, Cin = x.shape
    taps, Cin2, Cout = v.shape
    assert taps == 4 and Cin2 == Cin

    kern = functools.partial(_conv2x2_kernel, w_out=W, h_in=H,
                             row_off=row_off, pad_left=pad_left)

    def x_map(n, i, da):
        r = i + da + row_off
        r = jnp.maximum(jnp.minimum(r, H - 1), 0)   # clamp; masked in-kernel
        return (n, r, 0, 0)

    y, stats = pl.pallas_call(
        kern,
        out_shape=(jax.ShapeDtypeStruct((N, H, W, Cout), jnp.float32),
                   jax.ShapeDtypeStruct((N, 2, 128), jnp.float32)),
        grid_spec=pltpu.PrefetchScalarGridSpec(
            num_scalar_prefetch=0,
            grid=(N, H, 2),
            in_specs=[
                pl.BlockSpec((1, 1, W, Cin), x_map),
                pl.BlockSpec((4, Cin, Cout), lambda n, i, da: (0, 0, 0)),  # resident
                pl.BlockSpec((1, Cout), lambda n, i, da: (0, 0)),          # resident
            ],
            out_specs=[
                pl.BlockSpec((1, 1, W, Cout), lambda n, i, da: (n, i, 0, 0)),
                pl.BlockSpec((1, 2, 128), lambda n, i, da: (n, 0, 0)),
            ],
        ),
        compiler_params=pltpu.CompilerParams(
            dimension_semantics=("parallel", "arbitrary", "arbitrary")),
    )(x, v, bias.reshape(1, Cout))
    return y, stats


# ------------------- tiled elementwise LN-affine (+ReLU +res) ---------------

def _affine_relu_add_kernel(x_ref, sc_ref, sh_ref, res_ref, o_ref):
    sc = sc_ref[...].reshape(1, 1, 1, -1)
    sh = sh_ref[...].reshape(1, 1, 1, -1)
    o_ref[...] = jnp.maximum(x_ref[...] * sc + sh, 0.0) + res_ref[...]


def _affine_kernel(x_ref, sc_ref, sh_ref, o_ref):
    sc = sc_ref[...].reshape(1, 1, 1, -1)
    sh = sh_ref[...].reshape(1, 1, 1, -1)
    o_ref[...] = x_ref[...] * sc + sh


def _pick_rows(h, bytes_per_row, budget=2 * 1024 * 1024):
    t = max(1, min(h, budget // max(bytes_per_row, 1)))
    while h % t:
        t -= 1
    return t


def _elementwise_call(kernel, x, scale, shift, extra=None):
    N, H, W, Ce = x.shape
    tb = _pick_rows(H, W * Ce * 4)
    grid = (N, H // tb)
    big = pl.BlockSpec((1, tb, W, Ce), lambda n, b: (n, b, 0, 0))
    vec = pl.BlockSpec((1, 1, Ce), lambda n, b: (n, 0, 0))
    ins = [x, scale, shift] + ([extra] if extra is not None else [])
    in_specs = [big, vec, vec] + ([big] if extra is not None else [])
    return pl.pallas_call(
        kernel,
        out_shape=jax.ShapeDtypeStruct(x.shape, x.dtype),
        grid_spec=pltpu.PrefetchScalarGridSpec(
            num_scalar_prefetch=0, grid=grid,
            in_specs=in_specs, out_specs=big),
        compiler_params=pltpu.CompilerParams(
            dimension_semantics=("parallel", "parallel")),
    )(*ins)


# --------------------------- weight construction ----------------------------

def _build_v1(wt):
    """ConvTranspose2d(k3,s2,p1,op1) weight (Cin,Cout,3,3) -> 4 taps (Cin,4*Cout)."""
    c_in, c_out = wt.shape[0], wt.shape[1]
    kmap = {(0, 0): 1, (1, 0): 2, (1, 1): 0}   # (output phase, tap) -> kernel index
    v = jnp.zeros((2, 2, c_in, 4 * c_out), wt.dtype)
    for da in range(2):
        for db in range(2):
            for a in range(2):
                for b in range(2):
                    if (a, da) in kmap and (b, db) in kmap:
                        kh, kw = kmap[(a, da)], kmap[(b, db)]
                        col = (a * 2 + b) * c_out
                        v = v.at[da, db, :, col:col + c_out].set(wt[:, :, kh, kw])
    return v.reshape(4, c_in, 4 * c_out)


def _build_v2(w2):
    """Conv2d(k3,s2,pad1) weight (Cout,Cin,3,3) -> 4 taps on super layout (4*Cin,Cout)."""
    c_out, c_in = w2.shape[0], w2.shape[1]
    kmap = {(1, 0): 0, (0, 1): 1, (1, 1): 2}   # (input phase, tap) -> kernel index
    v = jnp.zeros((2, 2, 4 * c_in, c_out), w2.dtype)
    for du in range(2):
        for dv in range(2):
            for a in range(2):
                for b in range(2):
                    if (a, du) in kmap and (b, dv) in kmap:
                        ki, kj = kmap[(a, du)], kmap[(b, dv)]
                        row = (a * 2 + b) * c_in
                        v = v.at[du, dv, row:row + c_in, :].set(
                            jnp.transpose(w2[:, :, ki, kj]))
    return v.reshape(4, 4 * c_in, c_out)


# ---------------------------- LN affine from stats --------------------------

def _ln_affine_params(stats, n_elems, gamma_eff, beta_eff, eps):
    s = stats[:, 0, 0]
    s2 = stats[:, 1, 0]
    mean = s / n_elems
    var = jnp.maximum((s2 - n_elems * mean * mean) / (n_elems - 1), 0.0)  # unbiased
    inv = 1.0 / (jnp.sqrt(var) + eps)
    scale = inv[:, None] * gamma_eff[None, :]                  # (N, Ceff)
    shift = beta_eff[None, :] - mean[:, None] * scale
    return scale[:, None, :], shift[:, None, :]                # (N, 1, Ceff)


# --------------------------------- forward ----------------------------------

def resblock_reverse_forward(x_nchw, pre_x_nchw, params, eps=EPS):
    N, C, H, W = x_nchw.shape
    x = jnp.transpose(x_nchw, (0, 2, 3, 1))                    # (N, H, W, C)
    # residual in super-pixel layout: channel k = (a*2+b)*C + c, y[2i+a,2j+b,c]
    pre_s = jnp.transpose(pre_x_nchw.reshape(N, C, H, 2, W, 2),
                          (0, 2, 4, 3, 5, 1)).reshape(N, H, W, 4 * C)

    # layer1: ConvTranspose2d(3, s2, p1, op1) as fused 2x2-tap conv -> (N,H,W,4C)
    v1 = _build_v1(params["wt"])
    b1 = jnp.tile(params["bt"], 4)
    y_pre, st1 = conv2x2_ln_stats(x, v1, b1, row_off=0, pad_left=False)

    # per-sample LayerNorm (unbiased std) + ReLU + residual, as per-channel affine
    sc1, sh1 = _ln_affine_params(st1, H * W * 4 * C,
                                 jnp.tile(params["g1"], 4),
                                 jnp.tile(params["beta1"], 4), eps)
    y = _elementwise_call(_affine_relu_add_kernel, y_pre, sc1, sh1, extra=pre_s)

    # layer2: ZeroPad2d(1) + Conv2d(3, s2) on super-pixel layout -> (N,H,W,C)
    v2 = _build_v2(params["w2"])
    z_pre, st2 = conv2x2_ln_stats(y, v2, params["b2"], row_off=-1, pad_left=True)

    sc2, sh2 = _ln_affine_params(st2, H * W * C, params["g2"], params["beta2"], eps)
    z = _elementwise_call(_affine_kernel, z_pre, sc2, sh2)

    return jnp.transpose(z, (0, 3, 1, 2))                      # back to NCHW


# --------------------------- pure-JAX reference -----------------------------

def _ln_ref(x_nchw, gamma, beta, eps=EPS):
    N = x_nchw.shape[0]
    flat = x_nchw.reshape(N, -1)
    mean = flat.mean(axis=1)
    std = jnp.sqrt(((flat - mean[:, None]) ** 2).sum(axis=1) / (flat.shape[1] - 1))
    y = (x_nchw - mean.reshape(N, 1, 1, 1)) / (std.reshape(N, 1, 1, 1) + eps)
    return y * gamma.reshape(1, -1, 1, 1) + beta.reshape(1, -1, 1, 1)


def reference_forward(x, pre_x, params):
    w_c = jnp.transpose(params["wt"], (1, 0, 2, 3))[:, :, ::-1, ::-1]
    y = lax.conv_general_dilated(
        x, w_c, window_strides=(1, 1), padding=((1, 2), (1, 2)),
        lhs_dilation=(2, 2), dimension_numbers=("NCHW", "OIHW", "NCHW"))
    y = y + params["bt"].reshape(1, -1, 1, 1)
    y = _ln_ref(y, params["g1"], params["beta1"])
    y = jnp.maximum(y, 0.0)
    y = y + pre_x
    z = lax.conv_general_dilated(
        y, params["w2"], window_strides=(2, 2), padding=((1, 1), (1, 1)),
        dimension_numbers=("NCHW", "OIHW", "NCHW"))
    z = z + params["b2"].reshape(1, -1, 1, 1)
    return _ln_ref(z, params["g2"], params["beta2"])


# ----------------------------------- main ------------------------------------

if __name__ == "__main__":
    dim, N, H, W = 4, 2, 16, 16
    key = jax.random.PRNGKey(0)
    ks = jax.random.split(key, 8)

    params = {
        # ConvTranspose2d weight: (C_in, C_out, kh, kw); Conv2d weight: (C_out, C_in, kh, kw)
        "wt": jax.random.normal(ks[0], (dim, dim, 3, 3), jnp.float32) * 0.1,
        "bt": jax.random.normal(ks[1], (dim,), jnp.float32) * 0.1,
        "g1": jax.random.uniform(ks[2], (dim,), jnp.float32),     # LayerNorm gamma ~ U[0,1)
        "beta1": jnp.zeros((dim,), jnp.float32),
        "w2": jax.random.normal(ks[3], (dim, dim, 3, 3), jnp.float32) * 0.1,
        "b2": jax.random.normal(ks[4], (dim,), jnp.float32) * 0.1,
        "g2": jax.random.uniform(ks[5], (dim,), jnp.float32),
        "beta2": jnp.zeros((dim,), jnp.float32),
    }

    x = jax.random.normal(ks[6], (N, dim, H, W), jnp.float32)
    pre_x = jax.random.normal(ks[7], (N, dim, 2 * H, 2 * W), jnp.float32)

    out = jax.jit(resblock_reverse_forward)(x, pre_x, params)
    out = jax.block_until_ready(out)

    ref = reference_forward(x, pre_x, params)
    assert out.shape == (N, dim, H, W), out.shape
    err = float(jnp.max(jnp.abs(out - ref)))
    assert jnp.allclose(out, ref, atol=1e-4, rtol=1e-4), err

    print("KERNEL_OK")
</pallas_src>

<mosaic_0001>
module attributes {stable_mosaic.version = 11 : i64} {
  func.func @_conv2x2_kernel(%arg0: i32, %arg1: i32, %arg2: i32, %arg3: memref<1x1x16x4xf32, #tpu.memory_space<vmem>>, %arg4: memref<4x4x16xf32, #tpu.memory_space<vmem>>, %arg5: memref<1x16xf32, #tpu.memory_space<vmem>>, %arg6: memref<1x1x16x16xf32, #tpu.memory_space<vmem>>, %arg7: memref<1x2x128xf32, #tpu.memory_space<vmem>>) attributes {dimension_semantics = [#tpu.dimension_semantics<parallel>, #tpu.dimension_semantics<arbitrary>, #tpu.dimension_semantics<arbitrary>], iteration_bounds = array<i64: 2, 16, 2>, scalar_prefetch = 0 : i64, scratch_operands = 0 : i64, tpu.core_type = #tpu.core_type<tc>, window_params = [{transform_indices = @transform_0, window_bounds = array<i64: 1, 1, 16, 4>}, {pipeline_mode = #tpu.pipeline_mode<synchronous>, transform_indices = @transform_1, window_bounds = array<i64: 4, 4, 16>}, {pipeline_mode = #tpu.pipeline_mode<synchronous>, transform_indices = @transform_2, window_bounds = array<i64: 1, 16>}, {transform_indices = @transform_3, window_bounds = array<i64: 1, 1, 16, 16>}, {transform_indices = @transform_4, window_bounds = array<i64: 1, 2, 128>}]} {
    %c0_i32 = arith.constant 0 : i32
    %0 = arith.cmpi eq, %arg1, %c0_i32 : i32
    %c0_i32_0 = arith.constant 0 : i32
    %1 = arith.cmpi eq, %arg2, %c0_i32_0 : i32
    %2 = arith.andi %0, %1 : i1
    %3 = arith.extui %2 : i1 to i32
    %c0_i32_1 = arith.constant 0 : i32
    %4 = arith.cmpi ne, %3, %c0_i32_1 : i32
    scf.if %4 {
      %cst = arith.constant 0.000000e+00 : f32
      %18 = vector.broadcast %cst : f32 to vector<1x2x128xf32>
      %c0 = arith.constant 0 : index
      %c0_8 = arith.constant 0 : index
      %c0_9 = arith.constant 0 : index
      %19 = vector.load %arg7[%c0, %c0_8, %c0_9] : memref<1x2x128xf32, #tpu.memory_space<vmem>>, vector<1x2x128xf32>
      tpu.vector_store %arg7[%c0, %c0_8, %c0_9], %18 {strides = array<i32>} : memref<1x2x128xf32, #tpu.memory_space<vmem>>, vector<1x2x128xf32>,
    } else {
    }
    %c0_i32_2 = arith.constant 0 : i32
    %5 = arith.cmpi eq, %arg2, %c0_i32_2 : i32
    %6 = arith.extui %5 : i1 to i32
    %c0_i32_3 = arith.constant 0 : i32
    %7 = arith.cmpi ne, %6, %c0_i32_3 : i32
    scf.if %7 {
      %c0 = arith.constant 0 : index
      %c0_8 = arith.constant 0 : index
      %18 = vector.load %arg5[%c0, %c0_8] : memref<1x16xf32, #tpu.memory_space<vmem>>, vector<1x16xf32>
      %19 = vector.shape_cast %18 : vector<1x16xf32> to vector<1x16xf32>
      %20 = vector.broadcast %19 : vector<1x16xf32> to vector<16x16xf32>
      %c0_9 = arith.constant 0 : index
      %c0_10 = arith.constant 0 : index
      %c0_11 = arith.constant 0 : index
      %c0_12 = arith.constant 0 : index
      %21 = vector.load %arg6[%c0_9, %c0_10, %c0_11, %c0_12] : memref<1x1x16x16xf32, #tpu.memory_space<vmem>>, vector<1x1x16x16xf32>
      %22 = vector.shape_cast %21 : vector<1x1x16x16xf32> to vector<16x16xf32>
      %23 = vector.shape_cast %20 : vector<16x16xf32> to vector<1x1x16x16xf32>
      tpu.vector_store %arg6[%c0_9, %c0_10, %c0_11, %c0_12], %23 {strides = array<i32>} : memref<1x1x16x16xf32, #tpu.memory_space<vmem>>, vector<1x1x16x16xf32>,
    } else {
    }
    %8 = arith.addi %arg1, %arg2 : i32
    %c0_i32_4 = arith.constant 0 : i32
    %9 = arith.addi %8, %c0_i32_4 : i32
    %c0_i32_5 = arith.constant 0 : i32
    %10 = arith.cmpi sge, %9, %c0_i32_5 : i32
    %c15_i32 = arith.constant 15 : i32
    %11 = arith.cmpi sle, %9, %c15_i32 : i32
    %12 = arith.andi %10, %11 : i1
    %13 = arith.extui %12 : i1 to i32
    %c0_i32_6 = arith.constant 0 : i32
    %14 = arith.cmpi ne, %13, %c0_i32_6 : i32
    scf.if %14 {
      %c0 = arith.constant 0 : index
      %c0_8 = arith.constant 0 : index
      %c0_9 = arith.constant 0 : index
      %c0_10 = arith.constant 0 : index
      %18 = vector.load %arg3[%c0, %c0_8, %c0_9, %c0_10] : memref<1x1x16x4xf32, #tpu.memory_space<vmem>>, vector<1x1x16x4xf32>
      %19 = vector.shape_cast %18 : vector<1x1x16x4xf32> to vector<16x4xf32>
      %cst = arith.constant 0.000000e+00 : f32
      %20 = vector.broadcast %cst : f32 to vector<1x4xf32>
      %21 = tpu.concatenate %19, %20 in 0 : vector<16x4xf32>, vector<1x4xf32> -> vector<17x4xf32>
      %22 = vector.extract_strided_slice %21 {offsets = [0, 0], sizes = [16, 4], strides = [1, 1]} : vector<17x4xf32> to vector<16x4xf32>
      %c2_i32 = arith.constant 2 : i32
      %23 = arith.muli %c2_i32, %arg2 : i32
      %24 = arith.index_cast %23 : i32 to index
      %c0_11 = arith.constant 0 : index
      %c0_12 = arith.constant 0 : index
      %25 = vector.load %arg4[%24, %c0_11, %c0_12] : memref<4x4x16xf32, #tpu.memory_space<vmem>>, vector<1x4x16xf32>
      %26 = vector.shape_cast %25 : vector<1x4x16xf32> to vector<4x16xf32>
      %cst_13 = arith.constant dense<0.000000e+00> : vector<16x16xf32>
      %27 = tpu.matmul %22, %26, %cst_13 {dimension_numbers = #tpu.dot_dimension_numbers<[1], [0], [0], [1], [0, 0, 1, 1], [], []>} : vector<16x4xf32>, vector<4x16xf32>, vector<16x16xf32> -> vector<16x16xf32>
      %28 = vector.extract_strided_slice %21 {offsets = [1, 0], sizes = [16, 4], strides = [1, 1]} : vector<17x4xf32> to vector<16x4xf32>
      %c2_i32_14 = arith.constant 2 : i32
      %29 = arith.muli %c2_i32_14, %arg2 : i32
      %c1_i32_15 = arith.constant 1 : i32
      %30 = arith.addi %29, %c1_i32_15 : i32
      %31 = arith.index_cast %30 : i32 to index
      %c0_16 = arith.constant 0 : index
      %c0_17 = arith.constant 0 : index
      %32 = vector.load %arg4[%31, %c0_16, %c0_17] : memref<4x4x16xf32, #tpu.memory_space<vmem>>, vector<1x4x16xf32>
      %33 = vector.shape_cast %32 : vector<1x4x16xf32> to vector<4x16xf32>
      %cst_18 = arith.constant dense<0.000000e+00> : vector<16x16xf32>
      %34 = tpu.matmul %28, %33, %cst_18 {dimension_numbers = #tpu.dot_dimension_numbers<[1], [0], [0], [1], [0, 0, 1, 1], [], []>} : vector<16x4xf32>, vector<4x16xf32>, vector<16x16xf32> -> vector<16x16xf32>
      %c0_19 = arith.constant 0 : index
      %c0_20 = arith.constant 0 : index
      %c0_21 = arith.constant 0 : index
      %c0_22 = arith.constant 0 : index
      %35 = vector.load %arg6[%c0_19, %c0_20, %c0_21, %c0_22] : memref<1x1x16x16xf32, #tpu.memory_space<vmem>>, vector<1x1x16x16xf32>
      %36 = vector.shape_cast %35 : vector<1x1x16x16xf32> to vector<16x16xf32>
      %37 = arith.addf %36, %27 : vector<16x16xf32>
      %38 = arith.addf %37, %34 : vector<16x16xf32>
      %c0_23 = arith.constant 0 : index
      %c0_24 = arith.constant 0 : index
      %c0_25 = arith.constant 0 : index
      %c0_26 = arith.constant 0 : index
      %39 = vector.load %arg6[%c0_23, %c0_24, %c0_25, %c0_26] : memref<1x1x16x16xf32, #tpu.memory_space<vmem>>, vector<1x1x16x16xf32>
      %40 = vector.shape_cast %39 : vector<1x1x16x16xf32> to vector<16x16xf32>
      %41 = vector.shape_cast %38 : vector<16x16xf32> to vector<1x1x16x16xf32>
      tpu.vector_store %arg6[%c0_23, %c0_24, %c0_25, %c0_26], %41 {strides = array<i32>} : memref<1x1x16x16xf32, #tpu.memory_space<vmem>>, vector<1x1x16x16xf32>,
    } else {
    }
    %c1_i32 = arith.constant 1 : i32
    %15 = arith.cmpi eq, %arg2, %c1_i32 : i32
    %16 = arith.extui %15 : i1 to i32
    %c0_i32_7 = arith.constant 0 : i32
    %17 = arith.cmpi ne, %16, %c0_i32_7 : i32
    scf.if %17 {
      %c0 = arith.constant 0 : index
      %c0_8 = arith.constant 0 : index
      %c0_9 = arith.constant 0 : index
      %c0_10 = arith.constant 0 : index
      %18 = vector.load %arg6[%c0, %c0_8, %c0_9, %c0_10] : memref<1x1x16x16xf32, #tpu.memory_space<vmem>>, vector<1x1x16x16xf32>
      %19 = vector.shape_cast %18 : vector<1x1x16x16xf32> to vector<16x16xf32>
      %20 = vector.shape_cast %19 : vector<16x16xf32> to vector<1x16x16xf32>
      %cst = arith.constant dense<0.000000e+00> : vector<1xf32>
      %21 = vector.multi_reduction <add>, %20, %cst [1, 2] : vector<1x16x16xf32> to vector<1xf32>
      %22 = vector.shape_cast %21 : vector<1xf32> to vector<1x1x1xf32>
      %23 = vector.extract %22[0, 0, 0] : f32 from vector<1x1x1xf32>
      %24 = arith.mulf %19, %19 : vector<16x16xf32>
      %25 = vector.shape_cast %24 : vector<16x16xf32> to vector<1x16x16xf32>
      %cst_11 = arith.constant dense<0.000000e+00> : vector<1xf32>
      %26 = vector.multi_reduction <add>, %25, %cst_11 [1, 2] : vector<1x16x16xf32> to vector<1xf32>
      %27 = vector.shape_cast %26 : vector<1xf32> to vector<1x1x1xf32>
      %28 = vector.extract %27[0, 0, 0] : f32 from vector<1x1x1xf32>
      %29 = tpu.iota {dimensions = array<i32: 0>} : vector<2x128xi32>
      %c0_12 = arith.constant 0 : index
      %c0_13 = arith.constant 0 : index
      %c0_14 = arith.constant 0 : index
      %30 = vector.load %arg7[%c0_12, %c0_13, %c0_14] : memref<1x2x128xf32, #tpu.memory_space<vmem>>, vector<1x2x128xf32>
      %31 = vector.shape_cast %30 : vector<1x2x128xf32> to vector<2x128xf32>
      %c0_i32_15 = arith.constant 0 : i32
      %32 = vector.broadcast %c0_i32_15 : i32 to vector<2x128xi32>
      %33 = arith.cmpi eq, %29, %32 : vector<2x128xi32>
      %34 = vector.broadcast %23 : f32 to vector<2x128xf32>
      %35 = vector.broadcast %28 : f32 to vector<2x128xf32>
      %36 = arith.select %33, %34, %35 : vector<2x128xi1>, vector<2x128xf32>
      %37 = arith.addf %31, %36 : vector<2x128xf32>
      %c0_16 = arith.constant 0 : index
      %c0_17 = arith.constant 0 : index
      %c0_18 = arith.constant 0 : index
      %38 = vector.load %arg7[%c0_16, %c0_17, %c0_18] : memref<1x2x128xf32, #tpu.memory_space<vmem>>, vector<1x2x128xf32>
      %39 = vector.shape_cast %38 : vector<1x2x128xf32> to vector<2x128xf32>
      %40 = vector.shape_cast %37 : vector<2x128xf32> to vector<1x2x128xf32>
      tpu.vector_store %arg7[%c0_16, %c0_17, %c0_18], %40 {strides = array<i32>} : memref<1x2x128xf32, #tpu.memory_space<vmem>>, vector<1x2x128xf32>,
    } else {
    }
    return
  }
  func.func @transform_0(%arg0: i32, %arg1: i32, %arg2: i32) -> (i32, i32, i32, i32) {
    %0 = arith.addi %arg1, %arg2 : i32
    %c0_i32 = arith.constant 0 : i32
    %1 = arith.addi %0, %c0_i32 : i32
    %c15_i32 = arith.constant 15 : i32
    %2 = arith.minsi %1, %c15_i32 : i32
    %c0_i32_0 = arith.constant 0 : i32
    %3 = arith.maxsi %2, %c0_i32_0 : i32
    %c0_i32_1 = arith.constant 0 : i32
    %c0_i32_2 = arith.constant 0 : i32
    %c0_i32_3 = arith.constant 0 : i32
    return %arg0, %3, %c0_i32_1, %c0_i32_2 : i32, i32, i32, i32
  }
  func.func @transform_1(%arg0: i32, %arg1: i32, %arg2: i32) -> (i32, i32, i32) {
    %c0_i32 = arith.constant 0 : i32
    %c0_i32_0 = arith.constant 0 : i32
    %c0_i32_1 = arith.constant 0 : i32
    %c0_i32_2 = arith.constant 0 : i32
    return %c0_i32, %c0_i32_0, %c0_i32_1 : i32, i32, i32
  }
  func.func @transform_2(%arg0: i32, %arg1: i32, %arg2: i32) -> (i32, i32) {
    %c0_i32 = arith.constant 0 : i32
    %c0_i32_0 = arith.constant 0 : i32
    %c0_i32_1 = arith.constant 0 : i32
    return %c0_i32, %c0_i32_0 : i32, i32
  }
  func.func @transform_3(%arg0: i32, %arg1: i32, %arg2: i32) -> (i32, i32, i32, i32) {
    %c0_i32 = arith.constant 0 : i32
    %c0_i32_0 = arith.constant 0 : i32
    %c0_i32_1 = arith.constant 0 : i32
    return %arg0, %arg1, %c0_i32, %c0_i32_0 : i32, i32, i32, i32
  }
  func.func @transform_4(%arg0: i32, %arg1: i32, %arg2: i32) -> (i32, i32, i32) {
    %c0_i32 = arith.constant 0 : i32
    %c0_i32_0 = arith.constant 0 : i32
    %c0_i32_1 = arith.constant 0 : i32
    return %arg0, %c0_i32, %c0_i32_0 : i32, i32, i32
  }
}

module attributes {stable_mosaic.version = 11 : i64} {
  func.func @_affine_relu_add_kernel(%arg0: i32, %arg1: i32, %arg2: memref<1x16x16x16xf32, #tpu.memory_space<vmem>>, %arg3: memref<1x1x16xf32, #tpu.memory_space<vmem>>, %arg4: memref<1x1x16xf32, #tpu.memory_space<vmem>>, %arg5: memref<1x16x16x16xf32, #tpu.memory_space<vmem>>, %arg6: memref<1x16x16x16xf32, #tpu.memory_space<vmem>>) attributes {dimension_semantics = [#tpu.dimension_semantics<parallel>, #tpu.dimension_semantics<parallel>], iteration_bounds = array<i64: 2, 1>, scalar_prefetch = 0 : i64, scratch_operands = 0 : i64, tpu.core_type = #tpu.core_type<tc>, window_params = [{transform_indices = @transform_0, window_bounds = array<i64: 1, 16, 16, 16>}, {transform_indices = @transform_1, window_bounds = array<i64: 1, 1, 16>}, {transform_indices = @transform_2, window_bounds = array<i64: 1, 1, 16>}, {transform_indices = @transform_3, window_bounds = array<i64: 1, 16, 16, 16>}, {transform_indices = @transform_4, window_bounds = array<i64: 1, 16, 16, 16>}]} {
    %c0 = arith.constant 0 : index
    %c0_0 = arith.constant 0 : index
    %c0_1 = arith.constant 0 : index
    %0 = vector.load %arg3[%c0, %c0_0, %c0_1] : memref<1x1x16xf32, #tpu.memory_space<vmem>>, vector<1x1x16xf32>
    %1 = vector.shape_cast %0 : vector<1x1x16xf32> to vector<1x1x1x16xf32>
    %c0_2 = arith.constant 0 : index
    %c0_3 = arith.constant 0 : index
    %c0_4 = arith.constant 0 : index
    %2 = vector.load %arg4[%c0_2, %c0_3, %c0_4] : memref<1x1x16xf32, #tpu.memory_space<vmem>>, vector<1x1x16xf32>
    %3 = vector.shape_cast %2 : vector<1x1x16xf32> to vector<1x1x1x16xf32>
    %c0_5 = arith.constant 0 : index
    %c0_6 = arith.constant 0 : index
    %c0_7 = arith.constant 0 : index
    %c0_8 = arith.constant 0 : index
    %4 = vector.load %arg2[%c0_5, %c0_6, %c0_7, %c0_8] : memref<1x16x16x16xf32, #tpu.memory_space<vmem>>, vector<1x16x16x16xf32>
    %5 = vector.broadcast %1 : vector<1x1x1x16xf32> to vector<1x16x16x16xf32>
    %6 = arith.mulf %4, %5 : vector<1x16x16x16xf32>
    %7 = vector.broadcast %3 : vector<1x1x1x16xf32> to vector<1x16x16x16xf32>
    %8 = arith.addf %6, %7 : vector<1x16x16x16xf32>
    %cst = arith.constant 0.000000e+00 : f32
    %9 = vector.broadcast %cst : f32 to vector<1x16x16x16xf32>
    %10 = arith.maximumf %8, %9 : vector<1x16x16x16xf32>
    %c0_9 = arith.constant 0 : index
    %c0_10 = arith.constant 0 : index
    %c0_11 = arith.constant 0 : index
    %c0_12 = arith.constant 0 : index
    %11 = vector.load %arg5[%c0_9, %c0_10, %c0_11, %c0_12] : memref<1x16x16x16xf32, #tpu.memory_space<vmem>>, vector<1x16x16x16xf32>
    %12 = arith.addf %10, %11 : vector<1x16x16x16xf32>
    %c0_13 = arith.constant 0 : index
    %c0_14 = arith.constant 0 : index
    %c0_15 = arith.constant 0 : index
    %c0_16 = arith.constant 0 : index
    %13 = vector.load %arg6[%c0_13, %c0_14, %c0_15, %c0_16] : memref<1x16x16x16xf32, #tpu.memory_space<vmem>>, vector<1x16x16x16xf32>
    tpu.vector_store %arg6[%c0_13, %c0_14, %c0_15, %c0_16], %12 {strides = array<i32>} : memref<1x16x16x16xf32, #tpu.memory_space<vmem>>, vector<1x16x16x16xf32>,
    return
  }
  func.func @transform_0(%arg0: i32, %arg1: i32) -> (i32, i32, i32, i32) {
    %c0_i32 = arith.constant 0 : i32
    %c0_i32_0 = arith.constant 0 : i32
    %c0_i32_1 = arith.constant 0 : i32
    return %arg0, %arg1, %c0_i32, %c0_i32_0 : i32, i32, i32, i32
  }
  func.func @transform_1(%arg0: i32, %arg1: i32) -> (i32, i32, i32) {
    %c0_i32 = arith.constant 0 : i32
    %c0_i32_0 = arith.constant 0 : i32
    %c0_i32_1 = arith.constant 0 : i32
    return %arg0, %c0_i32, %c0_i32_0 : i32, i32, i32
  }
  func.func @transform_2(%arg0: i32, %arg1: i32) -> (i32, i32, i32) {
    %c0_i32 = arith.constant 0 : i32
    %c0_i32_0 = arith.constant 0 : i32
    %c0_i32_1 = arith.constant 0 : i32
    return %arg0, %c0_i32, %c0_i32_0 : i32, i32, i32
  }
  func.func @transform_3(%arg0: i32, %arg1: i32) -> (i32, i32, i32, i32) {
    %c0_i32 = arith.constant 0 : i32
    %c0_i32_0 = arith.constant 0 : i32
    %c0_i32_1 = arith.constant 0 : i32
    return %arg0, %arg1, %c0_i32, %c0_i32_0 : i32, i32, i32, i32
  }
  func.func @transform_4(%arg0: i32, %arg1: i32) -> (i32, i32, i32, i32) {
    %c0_i32 = arith.constant 0 : i32
    %c0_i32_0 = arith.constant 0 : i32
    %c0_i32_1 = arith.constant 0 : i32
    return %arg0, %arg1, %c0_i32, %c0_i32_0 : i32, i32, i32, i32
  }
}

module attributes {stable_mosaic.version = 11 : i64} {
  func.func @_affine_kernel(%arg0: i32, %arg1: i32, %arg2: memref<1x16x16x4xf32, #tpu.memory_space<vmem>>, %arg3: memref<1x1x4xf32, #tpu.memory_space<vmem>>, %arg4: memref<1x1x4xf32, #tpu.memory_space<vmem>>, %arg5: memref<1x16x16x4xf32, #tpu.memory_space<vmem>>) attributes {dimension_semantics = [#tpu.dimension_semantics<parallel>, #tpu.dimension_semantics<parallel>], iteration_bounds = array<i64: 2, 1>, scalar_prefetch = 0 : i64, scratch_operands = 0 : i64, tpu.core_type = #tpu.core_type<tc>, window_params = [{transform_indices = @transform_0, window_bounds = array<i64: 1, 16, 16, 4>}, {transform_indices = @transform_1, window_bounds = array<i64: 1, 1, 4>}, {transform_indices = @transform_2, window_bounds = array<i64: 1, 1, 4>}, {transform_indices = @transform_3, window_bounds = array<i64: 1, 16, 16, 4>}]} {
    %c0 = arith.constant 0 : index
    %c0_0 = arith.constant 0 : index
    %c0_1 = arith.constant 0 : index
    %0 = vector.load %arg3[%c0, %c0_0, %c0_1] : memref<1x1x4xf32, #tpu.memory_space<vmem>>, vector<1x1x4xf32>
    %1 = vector.shape_cast %0 : vector<1x1x4xf32> to vector<1x1x1x4xf32>
    %c0_2 = arith.constant 0 : index
    %c0_3 = arith.constant 0 : index
    %c0_4 = arith.constant 0 : index
    %2 = vector.load %arg4[%c0_2, %c0_3, %c0_4] : memref<1x1x4xf32, #tpu.memory_space<vmem>>, vector<1x1x4xf32>
    %3 = vector.shape_cast %2 : vector<1x1x4xf32> to vector<1x1x1x4xf32>
    %c0_5 = arith.constant 0 : index
    %c0_6 = arith.constant 0 : index
    %c0_7 = arith.constant 0 : index
    %c0_8 = arith.constant 0 : index
    %4 = vector.load %arg2[%c0_5, %c0_6, %c0_7, %c0_8] : memref<1x16x16x4xf32, #tpu.memory_space<vmem>>, vector<1x16x16x4xf32>
    %5 = vector.broadcast %1 : vector<1x1x1x4xf32> to vector<1x16x16x4xf32>
    %6 = arith.mulf %4, %5 : vector<1x16x16x4xf32>
    %7 = vector.broadcast %3 : vector<1x1x1x4xf32> to vector<1x16x16x4xf32>
    %8 = arith.addf %6, %7 : vector<1x16x16x4xf32>
    %c0_9 = arith.constant 0 : index
    %c0_10 = arith.constant 0 : index
    %c0_11 = arith.constant 0 : index
    %c0_12 = arith.constant 0 : index
    %9 = vector.load %arg5[%c0_9, %c0_10, %c0_11, %c0_12] : memref<1x16x16x4xf32, #tpu.memory_space<vmem>>, vector<1x16x16x4xf32>
    tpu.vector_store %arg5[%c0_9, %c0_10, %c0_11, %c0_12], %8 {strides = array<i32>} : memref<1x16x16x4xf32, #tpu.memory_space<vmem>>, vector<1x16x16x4xf32>,
    return
  }
  func.func @transform_0(%arg0: i32, %arg1: i32) -> (i32, i32, i32, i32) {
    %c0_i32 = arith.constant 0 : i32
    %c0_i32_0 = arith.constant 0 : i32
    %c0_i32_1 = arith.constant 0 : i32
    return %arg0, %arg1, %c0_i32, %c0_i32_0 : i32, i32, i32, i32
  }
  func.func @transform_1(%arg0: i32, %arg1: i32) -> (i32, i32, i32) {
    %c0_i32 = arith.constant 0 : i32
    %c0_i32_0 = arith.constant 0 : i32
    %c0_i32_1 = arith.constant 0 : i32
    return %arg0, %c0_i32, %c0_i32_0 : i32, i32, i32
  }
  func.func @transform_2(%arg0: i32, %arg1: i32) -> (i32, i32, i32) {
    %c0_i32 = arith.constant 0 : i32
    %c0_i32_0 = arith.constant 0 : i32
    %c0_i32_1 = arith.constant 0 : i32
    return %arg0, %c0_i32, %c0_i32_0 : i32, i32, i32
  }
  func.func @transform_3(%arg0: i32, %arg1: i32) -> (i32, i32, i32, i32) {
    %c0_i32 = arith.constant 0 : i32
    %c0_i32_0 = arith.constant 0 : i32
    %c0_i32_1 = arith.constant 0 : i32
    return %arg0, %arg1, %c0_i32, %c0_i32_0 : i32, i32, i32, i32
  }
}

module attributes {stable_mosaic.version = 11 : i64} {
  func.func @_conv2x2_kernel(%arg0: i32, %arg1: i32, %arg2: i32, %arg3: memref<1x1x16x16xf32, #tpu.memory_space<vmem>>, %arg4: memref<4x16x4xf32, #tpu.memory_space<vmem>>, %arg5: memref<1x4xf32, #tpu.memory_space<vmem>>, %arg6: memref<1x1x16x4xf32, #tpu.memory_space<vmem>>, %arg7: memref<1x2x128xf32, #tpu.memory_space<vmem>>) attributes {dimension_semantics = [#tpu.dimension_semantics<parallel>, #tpu.dimension_semantics<arbitrary>, #tpu.dimension_semantics<arbitrary>], iteration_bounds = array<i64: 2, 16, 2>, scalar_prefetch = 0 : i64, scratch_operands = 0 : i64, tpu.core_type = #tpu.core_type<tc>, window_params = [{transform_indices = @transform_0, window_bounds = array<i64: 1, 1, 16, 16>}, {pipeline_mode = #tpu.pipeline_mode<synchronous>, transform_indices = @transform_1, window_bounds = array<i64: 4, 16, 4>}, {pipeline_mode = #tpu.pipeline_mode<synchronous>, transform_indices = @transform_2, window_bounds = array<i64: 1, 4>}, {transform_indices = @transform_3, window_bounds = array<i64: 1, 1, 16, 4>}, {transform_indices = @transform_4, window_bounds = array<i64: 1, 2, 128>}]} {
    %c0_i32 = arith.constant 0 : i32
    %0 = arith.cmpi eq, %arg1, %c0_i32 : i32
    %c0_i32_0 = arith.constant 0 : i32
    %1 = arith.cmpi eq, %arg2, %c0_i32_0 : i32
    %2 = arith.andi %0, %1 : i1
    %3 = arith.extui %2 : i1 to i32
    %c0_i32_1 = arith.constant 0 : i32
    %4 = arith.cmpi ne, %3, %c0_i32_1 : i32
    scf.if %4 {
      %cst = arith.constant 0.000000e+00 : f32
      %18 = vector.broadcast %cst : f32 to vector<1x2x128xf32>
      %c0 = arith.constant 0 : index
      %c0_7 = arith.constant 0 : index
      %c0_8 = arith.constant 0 : index
      %19 = vector.load %arg7[%c0, %c0_7, %c0_8] : memref<1x2x128xf32, #tpu.memory_space<vmem>>, vector<1x2x128xf32>
      tpu.vector_store %arg7[%c0, %c0_7, %c0_8], %18 {strides = array<i32>} : memref<1x2x128xf32, #tpu.memory_space<vmem>>, vector<1x2x128xf32>,
    } else {
    }
    %c0_i32_2 = arith.constant 0 : i32
    %5 = arith.cmpi eq, %arg2, %c0_i32_2 : i32
    %6 = arith.extui %5 : i1 to i32
    %c0_i32_3 = arith.constant 0 : i32
    %7 = arith.cmpi ne, %6, %c0_i32_3 : i32
    scf.if %7 {
      %c0 = arith.constant 0 : index
      %c0_7 = arith.constant 0 : index
      %18 = vector.load %arg5[%c0, %c0_7] : memref<1x4xf32, #tpu.memory_space<vmem>>, vector<1x4xf32>
      %19 = vector.shape_cast %18 : vector<1x4xf32> to vector<1x4xf32>
      %20 = vector.broadcast %19 : vector<1x4xf32> to vector<16x4xf32>
      %c0_8 = arith.constant 0 : index
      %c0_9 = arith.constant 0 : index
      %c0_10 = arith.constant 0 : index
      %c0_11 = arith.constant 0 : index
      %21 = vector.load %arg6[%c0_8, %c0_9, %c0_10, %c0_11] : memref<1x1x16x4xf32, #tpu.memory_space<vmem>>, vector<1x1x16x4xf32>
      %22 = vector.shape_cast %21 : vector<1x1x16x4xf32> to vector<16x4xf32>
      %23 = vector.shape_cast %20 : vector<16x4xf32> to vector<1x1x16x4xf32>
      tpu.vector_store %arg6[%c0_8, %c0_9, %c0_10, %c0_11], %23 {strides = array<i32>} : memref<1x1x16x4xf32, #tpu.memory_space<vmem>>, vector<1x1x16x4xf32>,
    } else {
    }
    %8 = arith.addi %arg1, %arg2 : i32
    %c-1_i32 = arith.constant -1 : i32
    %9 = arith.addi %8, %c-1_i32 : i32
    %c0_i32_4 = arith.constant 0 : i32
    %10 = arith.cmpi sge, %9, %c0_i32_4 : i32
    %c15_i32 = arith.constant 15 : i32
    %11 = arith.cmpi sle, %9, %c15_i32 : i32
    %12 = arith.andi %10, %11 : i1
    %13 = arith.extui %12 : i1 to i32
    %c0_i32_5 = arith.constant 0 : i32
    %14 = arith.cmpi ne, %13, %c0_i32_5 : i32
    scf.if %14 {
      %c0 = arith.constant 0 : index
      %c0_7 = arith.constant 0 : index
      %c0_8 = arith.constant 0 : index
      %c0_9 = arith.constant 0 : index
      %18 = vector.load %arg3[%c0, %c0_7, %c0_8, %c0_9] : memref<1x1x16x16xf32, #tpu.memory_space<vmem>>, vector<1x1x16x16xf32>
      %19 = vector.shape_cast %18 : vector<1x1x16x16xf32> to vector<16x16xf32>
      %cst = arith.constant 0.000000e+00 : f32
      %20 = vector.broadcast %cst : f32 to vector<1x16xf32>
      %21 = tpu.concatenate %20, %19 in 0 : vector<1x16xf32>, vector<16x16xf32> -> vector<17x16xf32>
      %22 = vector.extract_strided_slice %21 {offsets = [0, 0], sizes = [16, 16], strides = [1, 1]} : vector<17x16xf32> to vector<16x16xf32>
      %c2_i32 = arith.constant 2 : i32
      %23 = arith.muli %c2_i32, %arg2 : i32
      %24 = arith.index_cast %23 : i32 to index
      %c0_10 = arith.constant 0 : index
      %c0_11 = arith.constant 0 : index
      %25 = vector.load %arg4[%24, %c0_10, %c0_11] : memref<4x16x4xf32, #tpu.memory_space<vmem>>, vector<1x16x4xf32>
      %26 = vector.shape_cast %25 : vector<1x16x4xf32> to vector<16x4xf32>
      %cst_12 = arith.constant dense<0.000000e+00> : vector<16x4xf32>
      %27 = tpu.matmul %22, %26, %cst_12 {dimension_numbers = #tpu.dot_dimension_numbers<[1], [0], [0], [1], [0, 0, 1, 1], [], []>} : vector<16x16xf32>, vector<16x4xf32>, vector<16x4xf32> -> vector<16x4xf32>
      %28 = vector.extract_strided_slice %21 {offsets = [1, 0], sizes = [16, 16], strides = [1, 1]} : vector<17x16xf32> to vector<16x16xf32>
      %c2_i32_13 = arith.constant 2 : i32
      %29 = arith.muli %c2_i32_13, %arg2 : i32
      %c1_i32_14 = arith.constant 1 : i32
      %30 = arith.addi %29, %c1_i32_14 : i32
      %31 = arith.index_cast %30 : i32 to index
      %c0_15 = arith.constant 0 : index
      %c0_16 = arith.constant 0 : index
      %32 = vector.load %arg4[%31, %c0_15, %c0_16] : memref<4x16x4xf32, #tpu.memory_space<vmem>>, vector<1x16x4xf32>
      %33 = vector.shape_cast %32 : vector<1x16x4xf32> to vector<16x4xf32>
      %cst_17 = arith.constant dense<0.000000e+00> : vector<16x4xf32>
      %34 = tpu.matmul %28, %33, %cst_17 {dimension_numbers = #tpu.dot_dimension_numbers<[1], [0], [0], [1], [0, 0, 1, 1], [], []>} : vector<16x16xf32>, vector<16x4xf32>, vector<16x4xf32> -> vector<16x4xf32>
      %c0_18 = arith.constant 0 : index
      %c0_19 = arith.constant 0 : index
      %c0_20 = arith.constant 0 : index
      %c0_21 = arith.constant 0 : index
      %35 = vector.load %arg6[%c0_18, %c0_19, %c0_20, %c0_21] : memref<1x1x16x4xf32, #tpu.memory_space<vmem>>, vector<1x1x16x4xf32>
      %36 = vector.shape_cast %35 : vector<1x1x16x4xf32> to vector<16x4xf32>
      %37 = arith.addf %36, %27 : vector<16x4xf32>
      %38 = arith.addf %37, %34 : vector<16x4xf32>
      %c0_22 = arith.constant 0 : index
      %c0_23 = arith.constant 0 : index
      %c0_24 = arith.constant 0 : index
      %c0_25 = arith.constant 0 : index
      %39 = vector.load %arg6[%c0_22, %c0_23, %c0_24, %c0_25] : memref<1x1x16x4xf32, #tpu.memory_space<vmem>>, vector<1x1x16x4xf32>
      %40 = vector.shape_cast %39 : vector<1x1x16x4xf32> to vector<16x4xf32>
      %41 = vector.shape_cast %38 : vector<16x4xf32> to vector<1x1x16x4xf32>
      tpu.vector_store %arg6[%c0_22, %c0_23, %c0_24, %c0_25], %41 {strides = array<i32>} : memref<1x1x16x4xf32, #tpu.memory_space<vmem>>, vector<1x1x16x4xf32>,
    } else {
    }
    %c1_i32 = arith.constant 1 : i32
    %15 = arith.cmpi eq, %arg2, %c1_i32 : i32
    %16 = arith.extui %15 : i1 to i32
    %c0_i32_6 = arith.constant 0 : i32
    %17 = arith.cmpi ne, %16, %c0_i32_6 : i32
    scf.if %17 {
      %c0 = arith.constant 0 : index
      %c0_7 = arith.constant 0 : index
      %c0_8 = arith.constant 0 : index
      %c0_9 = arith.constant 0 : index
      %18 = vector.load %arg6[%c0, %c0_7, %c0_8, %c0_9] : memref<1x1x16x4xf32, #tpu.memory_space<vmem>>, vector<1x1x16x4xf32>
      %19 = vector.shape_cast %18 : vector<1x1x16x4xf32> to vector<16x4xf32>
      %20 = vector.shape_cast %19 : vector<16x4xf32> to vector<1x16x4xf32>
      %cst = arith.constant dense<0.000000e+00> : vector<1xf32>
      %21 = vector.multi_reduction <add>, %20, %cst [1, 2] : vector<1x16x4xf32> to vector<1xf32>
      %22 = vector.shape_cast %21 : vector<1xf32> to vector<1x1x1xf32>
      %23 = vector.extract %22[0, 0, 0] : f32 from vector<1x1x1xf32>
      %24 = arith.mulf %19, %19 : vector<16x4xf32>
      %25 = vector.shape_cast %24 : vector<16x4xf32> to vector<1x16x4xf32>
      %cst_10 = arith.constant dense<0.000000e+00> : vector<1xf32>
      %26 = vector.multi_reduction <add>, %25, %cst_10 [1, 2] : vector<1x16x4xf32> to vector<1xf32>
      %27 = vector.shape_cast %26 : vector<1xf32> to vector<1x1x1xf32>
      %28 = vector.extract %27[0, 0, 0] : f32 from vector<1x1x1xf32>
      %29 = tpu.iota {dimensions = array<i32: 0>} : vector<2x128xi32>
      %c0_11 = arith.constant 0 : index
      %c0_12 = arith.constant 0 : index
      %c0_13 = arith.constant 0 : index
      %30 = vector.load %arg7[%c0_11, %c0_12, %c0_13] : memref<1x2x128xf32, #tpu.memory_space<vmem>>, vector<1x2x128xf32>
      %31 = vector.shape_cast %30 : vector<1x2x128xf32> to vector<2x128xf32>
      %c0_i32_14 = arith.constant 0 : i32
      %32 = vector.broadcast %c0_i32_14 : i32 to vector<2x128xi32>
      %33 = arith.cmpi eq, %29, %32 : vector<2x128xi32>
      %34 = vector.broadcast %23 : f32 to vector<2x128xf32>
      %35 = vector.broadcast %28 : f32 to vector<2x128xf32>
      %36 = arith.select %33, %34, %35 : vector<2x128xi1>, vector<2x128xf32>
      %37 = arith.addf %31, %36 : vector<2x128xf32>
      %c0_15 = arith.constant 0 : index
      %c0_16 = arith.constant 0 : index
      %c0_17 = arith.constant 0 : index
      %38 = vector.load %arg7[%c0_15, %c0_16, %c0_17] : memref<1x2x128xf32, #tpu.memory_space<vmem>>, vector<1x2x128xf32>
      %39 = vector.shape_cast %38 : vector<1x2x128xf32> to vector<2x128xf32>
      %40 = vector.shape_cast %37 : vector<2x128xf32> to vector<1x2x128xf32>
      tpu.vector_store %arg7[%c0_15, %c0_16, %c0_17], %40 {strides = array<i32>} : memref<1x2x128xf32, #tpu.memory_space<vmem>>, vector<1x2x128xf32>,
    } else {
    }
    return
  }
  func.func @transform_0(%arg0: i32, %arg1: i32, %arg2: i32) -> (i32, i32, i32, i32) {
    %0 = arith.addi %arg1, %arg2 : i32
    %c-1_i32 = arith.constant -1 : i32
    %1 = arith.addi %0, %c-1_i32 : i32
    %c15_i32 = arith.constant 15 : i32
    %2 = arith.minsi %1, %c15_i32 : i32
    %c0_i32 = arith.constant 0 : i32
    %3 = arith.maxsi %2, %c0_i32 : i32
    %c0_i32_0 = arith.constant 0 : i32
    %c0_i32_1 = arith.constant 0 : i32
    %c0_i32_2 = arith.constant 0 : i32
    return %arg0, %3, %c0_i32_0, %c0_i32_1 : i32, i32, i32, i32
  }
  func.func @transform_1(%arg0: i32, %arg1: i32, %arg2: i32) -> (i32, i32, i32) {
    %c0_i32 = arith.constant 0 : i32
    %c0_i32_0 = arith.constant 0 : i32
    %c0_i32_1 = arith.constant 0 : i32
    %c0_i32_2 = arith.constant 0 : i32
    return %c0_i32, %c0_i32_0, %c0_i32_1 : i32, i32, i32
  }
  func.func @transform_2(%arg0: i32, %arg1: i32, %arg2: i32) -> (i32, i32) {
    %c0_i32 = arith.constant 0 : i32
    %c0_i32_0 = arith.constant 0 : i32
    %c0_i32_1 = arith.constant 0 : i32
    return %c0_i32, %c0_i32_0 : i32, i32
  }
  func.func @transform_3(%arg0: i32, %arg1: i32, %arg2: i32) -> (i32, i32, i32, i32) {
    %c0_i32 = arith.constant 0 : i32
    %c0_i32_0 = arith.constant 0 : i32
    %c0_i32_1 = arith.constant 0 : i32
    return %arg0, %arg1, %c0_i32, %c0_i32_0 : i32, i32, i32, i32
  }
  func.func @transform_4(%arg0: i32, %arg1: i32, %arg2: i32) -> (i32, i32, i32) {
    %c0_i32 = arith.constant 0 : i32
    %c0_i32_0 = arith.constant 0 : i32
    %c0_i32_1 = arith.constant 0 : i32
    return %arg0, %c0_i32, %c0_i32_0 : i32, i32, i32
  }
}

</mosaic_0001>

<bundles_post_ra>
// kernel: tile.18
= control target key start
LH: loop header
LB: loop body
LE: loop exit
PB: predicated region body
PF: predicated region fallthrough
CT: control target
= control target key end

     0   :  { %s22_s0 = inlined_call_operand.vmem [shape: f32[4], index: 0, kind: input, shape index: {}]   ;;  %s23_s1 = inlined_call_operand.vmem [shape: f32[4,4], index: 1, kind: output, shape index: {}]  }
   0x1   :  { %v4_v0 = vld [vmem:[%s22_s0] ss:$0 sm:$0xff] }
   0x2   :  { %5 = vst [vmem:[%s23_s1] sm:$0xf] %v4_v0 }

// kernel: tile.19
= control target key start
LH: loop header
LB: loop body
LE: loop exit
PB: predicated region body
PF: predicated region fallthrough
CT: control target
= control target key end

     0   :  { %vm7_vm0 = vcmask 31744   ;;  %s37_s8 = smov 4   ;;  %s38_s9 = smov 8   ;;  %vm13_vm1 = vcmask 130144   ;;  %vm19_vm2 = vcmask 97344   ;;  %vm25_vm3 = vcmask 64544   ;;  %s55_s0 = inlined_call_operand.vmem [shape: f32[4,4], index: 0, kind: input, shape index: {}]   ;;  %s56_s1 = inlined_call_operand.vmem [shape: f32[1,16], index: 1, kind: output, shape index: {}]  }
   0x1   :  { %v4_v0 = vld [vmem:[%s55_s0] sm:$0xf]  ;;  %s36_s0 = smov 12  }
   0x2   :  { %5 = vst [vmem:[#allocation1] sm:$0xf] %v4_v0 }
   0x9   :  { %v10_v1 = vld [vmem:[#allocation1 + $0x3] sm:$0x1]   ;;  %v22_v2 = vld [vmem:[#allocation1 + $0x1] sm:$0x1]   ;;  %v6_v3 = vld [vmem:[#allocation1] sm:$0x1]  }
   0xa   :  { %11 = vrot.lane.b32.xlu0 %v10_v1, %s36_s0  ;;  %23 = vrot.lane.b32.xlu1 %v22_v2, %s37_s8  ;;  %v16_v4 = vld [vmem:[#allocation1 + $0x2] sm:$0x1]   ;;  %8 = vst.msk [vmem:[#allocation0] sm:$0x1] %vm7_vm0, %v6_v3  }
   0xe   :  { %17 = vrot.lane.b32.xlu0 %v16_v4, %s38_s9 }
  0x7c   :  { %v12_v5 = vpop.permute.xlu0 %11   ;;  %v24_v6 = vpop.permute.xlu1 %23  }
  0x7d   :  { %14 = vst.msk [vmem:[#allocation0] sm:$0x1] %vm13_vm1, %v12_v5  }
  0x80   :  { %v18_v7 = vpop.permute.xlu0 %17  }
  0x81   :  { %20 = vst.msk [vmem:[#allocation0] sm:$0x1] %vm19_vm2, %v18_v7  }
  0x82   :  { %26 = vst.msk [vmem:[#allocation0] sm:$0x1] %vm25_vm3, %v24_v6  }
  0x89   :  { %v30_v8 = vld [vmem:[#allocation0] sm:$0x1] }
  0x8a   :  { %32 = vst [vmem:[%s56_s1] sm:$0x1] %v30_v8 }

// kernel: resblock_reverse_forward.4
= control target key start
LH: loop header
LB: loop body
LE: loop exit
PB: predicated region body
PF: predicated region fallthrough
CT: control target
= control target key end

     0   :  { %s904_s15 = smov 0   ;;  %s906_s16 = smov 0   ;;  %s1025_s0 = inlined_call_operand.vmem [shape: f32[2,16,16,4], index: 0, kind: input, shape index: {}]   ;;  %s1026_s1 = inlined_call_operand.vmem [shape: f32[4,4,16], index: 1, kind: input, shape index: {}]   ;;  %s1027_s2 = inlined_call_operand.vmem [shape: f32[1,16], index: 2, kind: input, shape index: {}]   ;;  %s1028_s3 = inlined_call_operand.vmem [shape: f32[2,16,16,16], index: 3, kind: output, shape index: {0}]   ;;  %s1029_s4 = inlined_call_operand.vmem [shape: f32[2,2,128], index: 4, kind: output, shape index: {1}]  }
   0x1   :  { %s908_s17 = smov 0   ;;  %s910_s18 = smov 0  }
   0x2   :  { %s912_s19 = smov 0   ;;  %s914_s20 = smov 0  }
   0x3   :  { %s916_s21 = smov 0  }
   0x4 LB: > { %s27_s22 = sadd.s32 1, %s863_s18  ;;  %s30_s23 = sadd.s32 1, %s867_s19  ;;  %s875_s21 = sphi %s916_s21, %s15_s21   ;;  %s871_s20 = sphi %s914_s20, %s1039_s20   ;;  %s867_s19 = sphi %s912_s19, %s1038_s19   ;;  %s863_s18 = sphi %s910_s18, %s1037_s18   ;;  %s859_s17 = sphi %s908_s17, %s1036_s17   ;;  %s855_s16 = sphi %s906_s16, %s1035_s16   ;;  %s851_s15 = sphi %s904_s15, %s1034_s15  }
   0x5   : > { %p28_p0 = scmp.ge.s32.totalorder %s27_s22, 2  ;;  %p702_p1 = scmp.ge.s32.totalorder %s875_s21, 1 }
   0x6   : > { %p212_p2 = scmp.lt.s32.totalorder %s875_s21, 65  ;;  %s34_s24 = sadd.s32 1, %s871_s20 }
   0x7   : > { %s1041_s22 = smov (%p28_p0, %s27_s22), 0  ;;  %s1043_s23 = smov (!%p28_p0, %s30_s23), %s867_s19 }
   0x8   : > { %p213_p3 = pnand %p702_p1, %p212_p2  ;;  %p32_p4 = scmp.ge.s32.totalorder %s1043_s23, 16 }
   0x9   : > { %s952_s25 = sadd.s32 (!%p213_p3), %s851_s15, %s855_s16  ;;  %p260_p6 = scmp.lt.s32.totalorder (!%p213_p3), %s859_s17, 1 }
   0xa   : > { %s1045_s23 = smov (%p32_p4, %s1043_s23), 0  ;;  %s1047_s24 = smov (!%p32_p4, %s34_s24), %s871_s20 }
   0xb   : > { %1030 = sst [smem:[#allocation2_spill]] %s1045_s23  ;;  %p36_p5 = scmp.ge.s32.totalorder %s1047_s24, 2 }
   0xc   : > { %216 = sbr.rel (%p213_p3) target bundleno = 490 (0x1ea), region = 32  ;;  %p256_p7 = scmp.lt.s32.totalorder (!%p213_p3), %s952_s25, 15 }
   0xd   : > { %s1049_s24 = smov (%p36_p5, %s1047_s24), 0  ;;  %p703_p8 = scmp.gt.s32.totalorder (!%p213_p3), %s952_s25, 0 }
   0xe   : > { %1031 = sst [smem:[#allocation3_spill]] %s1049_s24  ;;  %p276_p9 = scmp.lt.s32.totalorder (!%p213_p3), %s855_s16, 15 }
   0xf   : > { %p287_p11 = scmp.eq.s32.totalorder (!%p213_p3), %s855_s16, 0  ;;  %p288_p12 = scmp.eq.s32.totalorder (!%p213_p3), %s851_s15, 0 }
  0x11   : > { %p289_p13 = pnand (!%p213_p3), %p288_p12, %p287_p11 }
  0x13   : > { %s1051_s17 = smov (!%p260_p6, %s859_s17), 1  ;;  %v877_v0 = vmov (!%p289_p13), 0.0  }
  0x14   : > { %s257_s26 = scalar_select %p256_p7, %s952_s25, 15 }
  0x15   : > { %s709_s27 = sshll.u32 %s1051_s17, 5  ;;  %s714_s29 = sshll.u32 %s1051_s17, 1 }
  0x16   : > { %s1053_s26 = smov (!%p703_p8, %s257_s26), 0  ;;  %s962_s7 = scalar_lea.vmem %s1029_s4, %s714_s29 }
  0x17   : > { %s277_s28 = scalar_select %p276_p9, %s855_s16, 15 }
  0x18   : > { %p262_p10 = scmp.lt.s32.totalorder %s1053_s26, 15  ;;  %292 = sbr.rel (%p289_p13) target bundleno = 31 (0x1f), region = 36  ;;  %293 = vst [vmem:[%s962_s7] sm:$0x3] (!%p289_p13), %v877_v0 }
  0x19   : > { %s711_s30 = sshll.u32 %s277_s28, 1 }
  0x1a   : > { %s1055_s26 = smov (!%p262_p10, %s1053_s26), 15  ;;  %s280_s8 = sadd.s32 %s711_s30, %s709_s27 }
  0x1b   : > { %s708_s9 = sshll.u32 %s1055_s26, 1  ;;  %s713_s10 = sshll.u32 %s280_s8, 3 }
  0x1c   : > { %s266_s11 = sadd.s32 %s709_s27, %s708_s9  ;;  %s968_s14 = scalar_lea.vmem %s1028_s3, %s713_s10 }
  0x1d   : > { %s710_s24 = sshll.u32 %s266_s11, 3 }
  0x1e   : > { %s268_s23 = scalar_lea.vmem %s1025_s0, %s710_s24 }
  0x1f PF: > { %p715_p0 = scmp.ne.s32.totalorder %s851_s15, 0 }
  0x20   : > { %v716_v1 = vld [vmem:[%s1027_s2] ss:$0 sm:$0xff] (!%p715_p0)  ;;  %vm304_vm0 = vcmask (!%p715_p0), 130048  }
  0x21   : > { %296 = sbr.rel (%p715_p0) target bundleno = 40 (0x28), region = 40  ;;  %305 = vst.msk [vmem:[%s968_s14] sm:$0xff] (!%p715_p0), %vm304_vm0, %v716_v1  ;;  %306 = vst.msk [vmem:[%s968_s14 + $0x8] sm:$0xff] (!%p715_p0), %vm304_vm0, %v716_v1 }
  0x28 PF: > { %p308_p1 = scmp.ge.s32.totalorder %s952_s25, 0  ;;  %p309_p2 = scmp.le.s32.totalorder %s952_s25, 15 }
  0x2a   : > { %p310_p3 = pnand %p309_p2, %p308_p1 }
  0x2b   : > { %s737_s24 = sshll.u32 (!%p310_p3), %s851_s15, 3  ;;  %vm327_vm1 = vcmask (!%p310_p3), 1043456   ;;  %v314_v2 = vld [vmem:[%s268_s23] sm:$0xff] (!%p310_p3)  ;;  %vm320_vm2 = vcmask (!%p310_p3), 31744   ;;  %v315_v3 = vld [vmem:[%s268_s23 + $0x8] sm:$0xff] (!%p310_p3)  ;;  %vm411_vm3 = vcmask (!%p310_p3), 1046528  }
  0x2c   : > { %313 = sbr.rel (%p310_p3) target bundleno = 267 (0x10b), region = 44  ;;  %s318_s30 = scalar_lea.vmem (!%p310_p3), %s1026_s1, %s737_s24  ;;  %747 = vmatprep.mubr.msk.f32.mxu1 (!%p310_p3), %vm320_vm2, %v314_v2  ;;  %v412_v4 = vrot.slane (!%p310_p3), %v314_v2, 1  ;;  %v413_v5 = vrot.slane (!%p310_p3), %v315_v3, 1  ;;  %v878_v8 = vmov (!%p310_p3), 0.0   ;;  %v500_v14 = vld [vmem:[%s968_s14 + $0x8] sm:$0xff] (!%p310_p3)  ;;  %v499_v18 = vld [vmem:[%s968_s14] sm:$0xff] (!%p310_p3) }
  0x2d   : > { %v319_v6 = vld [vmem:[%s318_s30] sm:$0xf] (!%p310_p3)  ;;  %v724_v7 = vld [vmem:[%s318_s30 + $0x4] sm:$0xf] (!%p310_p3)  ;;  %v415_v9 = vrot.slane (!%p310_p3), %v878_v8, 1  ;;  %vm505_vm4 = vcmask (!%p310_p3), 130048  }
  0x2e   : > { %745 = vmatprep.subr.msk.mxu1 (!%p310_p3), %vm327_vm1, %v319_v6  ;;  %750 = vmatprep.subr.msk.mxu0 (!%p310_p3), %vm327_vm1, %v724_v7  ;;  %v414_v10 = vsel (!%p310_p3), %vm411_vm3, %v412_v4, %v413_v5 }
  0x2f   : > { %746 = vmatpush3.msk.msra.mxu1 (!%p310_p3), %vm327_vm1, %v319_v6  ;;  %751 = vmatpush3.msk.msra.mxu0 (!%p310_p3), %vm327_vm1, %v724_v7  ;;  %v416_v11 = vsel (!%p310_p3), %vm411_vm3, %v413_v5, %v415_v9 }
  0x30   : > { %752 = vmatprep.mubr.msk.f32.mxu0 (!%p310_p3), %vm320_vm2, %v414_v10  ;;  %748 = vmatmul.mubr.msk.f32.vlgmr.msra.gmra.mrb[0].mxu1 (!%p310_p3), %vm320_vm2, %v315_v3 }
  0x31   : > { %753 = vmatmul.mubr.msk.f32.vlgmr.msra.gmra.mrb[0].mxu0 (!%p310_p3), %vm320_vm2, %v416_v11 }
 0x103   : > { %v749_v12 = vpop.f32.mrb[0].mxu1 }
 0x104   : > { %v754_v13 = vpop.f32.mrb[0].mxu0  ;;  %v397_v15 = vpop.f32.mrb[1].mxu1 }
 0x105   : > { %v755_v16 = vadd.f32 %v754_v13, %v749_v12  ;;  %v490_v17 = vpop.f32.mrb[1].mxu0 }
 0x106   : > { %v757_v19 = vadd.f32 %v490_v17, %v397_v15 }
 0x107   : > { %v756_v20 = vadd.f32 %v755_v16, %v500_v14 }
 0x108   : > { %v758_v21 = vadd.f32 %v757_v19, %v499_v18 }
 0x109   : > { %507 = vst.msk [vmem:[%s968_s14 + $0x8] sm:$0xff] %vm505_vm4, %v756_v20 }
 0x10a   : > { %506 = vst.msk [vmem:[%s968_s14] sm:$0xff] %vm505_vm4, %v758_v21 }
 0x10b PF: > { %p728_p4 = scmp.ne.s32.totalorder %s851_s15, 1 }
 0x10c   : > { %vm514_vm5 = vcmask (!%p728_p4), 130048   ;;  %v541_v46 = vlaneseq (!%p728_p4)  ;;  %v543_v48 = vld [vmem:[%s962_s7] sm:$0x3] (!%p728_p4) }
 0x10d   : > { %511 = sbr.rel (%p728_p4) target bundleno = 490 (0x1ea), region = 48 }
 0x10e   : > { %v542_v47 = vshrl.u32 (!%p728_p4), %v541_v46, 7 }
 0x110   : > { %v513_v23 = vld [vmem:[%s968_s14 + $0x8] sm:$0xff] (!%p728_p4)  ;;  %vm544_vm6 = vcmp.eq.s32.totalorder (!%p728_p4), %v542_v47, 0 }
 0x111   : > { %v512_v22 = vld [vmem:[%s968_s14] sm:$0xff] (!%p728_p4)  ;;  %v516_v25 = vsel (!%p728_p4), %vm514_vm5, %v513_v23, 0.0  ;;  %v528_v27 = vmul.f32 (!%p728_p4), %v513_v23, %v513_v23 }
 0x112   : > { %v515_v24 = vsel (!%p728_p4), %vm514_vm5, %v512_v22, 0.0  ;;  %v527_v26 = vmul.f32 (!%p728_p4), %v512_v22, %v512_v22 }
 0x113   : > { %v517_v28 = vadd.f32 (!%p728_p4), %v516_v25, %v515_v24  ;;  %v530_v30 = vsel (!%p728_p4), %vm514_vm5, %v528_v27, 0.0 }
 0x114   : > { %v529_v29 = vsel %vm514_vm5, %v527_v26, 0.0 }
 0x115   : > { %518 = vadd.xlane.f32.xlu0 %v517_v28  ;;  %v531_v31 = vadd.f32 %v530_v30, %v529_v29 }
 0x119   : > { %532 = vadd.xlane.f32.xlu0 %v531_v31 }
 0x1a2   : > { %v519_v32 = vpop.xlane.xlu0 %518 }
 0x1a3   : > { %v520_v33 = vrot.slane %v519_v32, 4 }
 0x1a5   : > { %v521_v34 = vadd.f32 %v520_v33, %v519_v32 }
 0x1a6   : > { %v533_v35 = vpop.xlane.xlu0 %532 }
 0x1a7   : > { %v522_v36 = vrot.slane %v521_v34, 2  ;;  %v534_v37 = vrot.slane %v533_v35, 4 }
 0x1a9   : > { %v535_v38 = vadd.f32 %v534_v37, %v533_v35  ;;  %v523_v39 = vadd.f32 %v522_v36, %v521_v34 }
 0x1ab   : > { %v536_v40 = vrot.slane %v535_v38, 2  ;;  %v524_v41 = vrot.slane %v523_v39, 1 }
 0x1ad   : > { %v537_v42 = vadd.f32 %v536_v40, %v535_v38  ;;  %v525_v43 = vadd.f32 %v524_v41, %v523_v39 }
 0x1af   : > { %759 = vpush %v525_v43  ;;  %v538_v44 = vrot.slane %v537_v42, 1 }
 0x1b1   : > { %v539_v45 = vadd.f32 %v538_v44, %v537_v42 }
 0x1b3   : > { %761 = vpush %v539_v45 }
 0x1e0   : > { %s760_s15 = spop %759 }
 0x1e1   : > { %v545_v49 = vstv %s760_s15 }
 0x1e4   : > { %s762_s23 = spop %761 }
 0x1e5   : > { %v546_v50 = vstv %s762_s23 }
 0x1e6   : > { %v547_v51 = vsel %vm544_vm6, %v545_v49, %v546_v50 }
 0x1e7   : > { %v548_v52 = vadd.f32 %v547_v51, %v543_v48 }
 0x1e9   : > { %549 = vst [vmem:[%s962_s7] sm:$0x3] %v548_v52 }
 0x1ea PF: > { %s15_s21 = sadd.s32 1, %s875_s21   ;;  %s1032_s25 = sld [smem:[#allocation2_spill]] }
 0x1eb   : > { %p12_p5 = scmp.ge.s32.totalorder %s15_s21, 66   ;;  %s1033_s5 = sld [smem:[#allocation3_spill]] }
 0x1ec   : > { %s1034_s15 = smov %s863_s18  ;;  %s1035_s16 = smov %s867_s19 }
 0x1ed   : > { %s1036_s17 = smov %s871_s20  ;;  %s1037_s18 = smov %s1041_s22 }
 0x1ee   :  { %14 = sbr.rel (!%p12_p5) target bundleno = 4 (0x4), region = 92 }
 0x1f0   : > { %s1038_s19 = smov %s1032_s25 }
 0x1f1   : > { %s1039_s20 = smov %s1033_s5 }

// kernel: resblock_reverse_forward.5
= control target key start
LH: loop header
LB: loop body
LE: loop exit
PB: predicated region body
PF: predicated region fallthrough
CT: control target
= control target key end

     0   :  { %s774_s15 = smov 0   ;;  %s776_s16 = smov 0   ;;  %s1023_s0 = inlined_call_operand.vmem [shape: f32[2,16,16,16], index: 0, kind: input, shape index: {}]   ;;  %s1024_s1 = inlined_call_operand.vmem [shape: f32[2,1,16], index: 1, kind: input, shape index: {}]   ;;  %s1025_s2 = inlined_call_operand.vmem [shape: f32[2,1,16], index: 2, kind: input, shape index: {}]   ;;  %s1026_s3 = inlined_call_operand.vmem [shape: f32[2,16,16,16], index: 3, kind: input, shape index: {}]   ;;  %s1027_s4 = inlined_call_operand.vmem [shape: f32[2,16,16,16], index: 4, kind: output, shape index: {}]  }
   0x1   :  { %s778_s17 = smov 0  }
   0x2 LB: > { %s26_s18 = sadd.s32 1, %s743_s16  ;;  %p687_p0 = scmp.ge.s32.totalorder %s747_s17, 1  ;;  %s747_s17 = sphi %s778_s17, %s14_s17   ;;  %s743_s16 = sphi %s776_s16, %s1029_s16   ;;  %s739_s15 = sphi %s774_s15, %s1028_s15  }
   0x3   : > { %p28_p1 = scmp.ge.s32.totalorder %s26_s18, 2  ;;  %p218_p2 = scmp.lt.s32.totalorder %s747_s17, 3 }
   0x5   : > { %s1031_s18 = smov (%p28_p1, %s26_s18), 0  ;;  %p219_p3 = pnand %p687_p0, %p218_p2 }
   0x6   : > { %p271_p4 = scmp.lt.s32.totalorder (!%p219_p3), %s739_s15, 1  ;;  %vm515_vm0 = vcmask (!%p219_p3), 130048  }
   0x7   : > { %222 = sbr.rel (%p219_p3) target bundleno = 55 (0x37), region = 36 }
   0xe   : > { %s1033_s15 = smov (!%p271_p4, %s739_s15), 1 }
   0xf   : > { %s792_s19 = sshll.u32 %s1033_s15, 8  ;;  %s283_s22 = scalar_lea.vmem %s1024_s1, %s1033_s15 }
  0x10   : > { %s801_s25 = scalar_lea.vmem %s1023_s0, %s792_s19  ;;  %s286_s28 = scalar_lea.vmem %s1025_s2, %s1033_s15  ;;  %v806_v0 = vld [vmem:[%s283_s22] ss:$0 sm:$0xff] }
  0x11   : > { %v808_v1 = vld [vmem:[%s286_s28] ss:$0 sm:$0xff]  ;;  %v312_v3 = vld [vmem:[%s801_s25 + $0x8] sm:$0xff]  ;;  %s816_s5 = scalar_lea.vmem %s1026_s3, %s792_s19  ;;  %v313_v6 = vld [vmem:[%s801_s25 + $0x10] sm:$0xff]  ;;  %s842_s8 = scalar_lea.vmem %s1027_s4, %s792_s19 }
  0x12   : > { %v311_v2 = vld [vmem:[%s801_s25] sm:$0xff]  ;;  %v350_v5 = vmul.f32 %v806_v0, %v312_v3  ;;  %v351_v7 = vmul.f32 %v806_v0, %v313_v6  ;;  %v314_v8 = vld [vmem:[%s801_s25 + $0x18] sm:$0xff]  ;;  %v316_v13 = vld [vmem:[%s801_s25 + $0x28] sm:$0xff] }
  0x13   : > { %v349_v4 = vmul.f32 %v806_v0, %v311_v2  ;;  %v352_v11 = vmul.f32 %v806_v0, %v314_v8  ;;  %v315_v12 = vld [vmem:[%s801_s25 + $0x20] sm:$0xff]  ;;  %v452_v15 = vld [vmem:[%s816_s5 + $0x8] sm:$0xff]  ;;  %v354_v18 = vmul.f32 %v806_v0, %v316_v13  ;;  %v317_v19 = vld [vmem:[%s801_s25 + $0x30] sm:$0xff] }
  0x14   : > { %v388_v10 = vadd.f32 %v808_v1, %v350_v5  ;;  %v451_v14 = vld [vmem:[%s816_s5] sm:$0xff]  ;;  %v389_v16 = vadd.f32 %v808_v1, %v351_v7  ;;  %v353_v17 = vmul.f32 %v806_v0, %v315_v12  ;;  %v453_v22 = vld [vmem:[%s816_s5 + $0x10] sm:$0xff]  ;;  %v355_v24 = vmul.f32 %v806_v0, %v317_v19  ;;  %v318_v25 = vld [vmem:[%s801_s25 + $0x38] sm:$0xff] }
  0x15   : > { %v387_v9 = vadd.f32 %v808_v1, %v349_v4  ;;  %v390_v23 = vadd.f32 %v808_v1, %v352_v11  ;;  %v454_v27 = vld [vmem:[%s816_s5 + $0x18] sm:$0xff]  ;;  %v392_v29 = vadd.f32 %v808_v1, %v354_v18  ;;  %v356_v30 = vmul.f32 %v806_v0, %v318_v25  ;;  %v319_v31 = vld [vmem:[%s801_s25 + $0x40] sm:$0xff]  ;;  %v320_v32 = vld [vmem:[%s801_s25 + $0x48] sm:$0xff] }
  0x16   : > { %v420_v21 = vmax.f32 %v388_v10, 0.0  ;;  %v421_v26 = vmax.f32 %v389_v16, 0.0  ;;  %v391_v28 = vadd.f32 %v808_v1, %v353_v17  ;;  %v455_v36 = vld [vmem:[%s816_s5 + $0x20] sm:$0xff]  ;;  %v456_v37 = vld [vmem:[%s816_s5 + $0x28] sm:$0xff]  ;;  %v393_v38 = vadd.f32 %v808_v1, %v355_v24  ;;  %v321_v39 = vld [vmem:[%s801_s25 + $0x50] sm:$0xff] }
  0x17   : > { %v419_v20 = vmax.f32 %v387_v9, 0.0  ;;  %v422_v35 = vmax.f32 %v390_v23, 0.0  ;;  %v424_v42 = vmax.f32 %v392_v29, 0.0  ;;  %v457_v43 = vld [vmem:[%s816_s5 + $0x30] sm:$0xff]  ;;  %v394_v44 = vadd.f32 %v808_v1, %v356_v30  ;;  %v322_v45 = vld [vmem:[%s801_s25 + $0x58] sm:$0xff]  ;;  %v323_v51 = vld [vmem:[%s801_s25 + $0x60] sm:$0xff] }
  0x18   : > { %v484_v34 = vadd.f32 %v452_v15, %v420_v21  ;;  %v485_v40 = vadd.f32 %v453_v22, %v421_v26  ;;  %v423_v41 = vmax.f32 %v391_v28, 0.0  ;;  %v425_v47 = vmax.f32 %v393_v38, 0.0  ;;  %v458_v48 = vld [vmem:[%s816_s5 + $0x38] sm:$0xff]  ;;  %v324_v52 = vld [vmem:[%s801_s25 + $0x68] sm:$0xff]  ;;  %v325_v57 = vld [vmem:[%s801_s25 + $0x70] sm:$0xff] }
  0x19   : > { %v483_v33 = vadd.f32 %v451_v14, %v419_v20  ;;  %v486_v46 = vadd.f32 %v454_v27, %v422_v35  ;;  %v357_v49 = vmul.f32 %v806_v0, %v319_v31  ;;  %v358_v50 = vmul.f32 %v806_v0, %v320_v32  ;;  %v326_v62 = vld [vmem:[%s801_s25 + $0x78] sm:$0xff]  ;;  %v459_v2 = vld [vmem:[%s816_s5 + $0x40] sm:$0xff]  ;;  %v460_v3 = vld [vmem:[%s816_s5 + $0x48] sm:$0xff] }
  0x1a   : > { %517 = vst.msk [vmem:[%s842_s8 + $0x8] sm:$0xff] %vm515_vm0, %v484_v34  ;;  %518 = vst.msk [vmem:[%s842_s8 + $0x10] sm:$0xff] %vm515_vm0, %v485_v40  ;;  %v487_v53 = vadd.f32 %v455_v36, %v423_v41  ;;  %v488_v54 = vadd.f32 %v456_v37, %v424_v42  ;;  %v426_v55 = vmax.f32 %v394_v44, 0.0  ;;  %v359_v56 = vmul.f32 %v806_v0, %v321_v39  ;;  %v461_v9 = vld [vmem:[%s816_s5 + $0x50] sm:$0xff]  ;;  %v462_v13 = vld [vmem:[%s816_s5 + $0x58] sm:$0xff] }
  0x1b   : > { %516 = vst.msk [vmem:[%s842_s8] sm:$0xff] %vm515_vm0, %v483_v33  ;;  %519 = vst.msk [vmem:[%s842_s8 + $0x18] sm:$0xff] %vm515_vm0, %v486_v46  ;;  %v489_v58 = vadd.f32 %v457_v43, %v425_v47  ;;  %v395_v59 = vadd.f32 %v808_v1, %v357_v49  ;;  %v396_v60 = vadd.f32 %v808_v1, %v358_v50  ;;  %v327_v17 = vld [vmem:[%s801_s25 + $0x80] sm:$0xff]  ;;  %v328_v18 = vld [vmem:[%s801_s25 + $0x88] sm:$0xff] }
  0x1c   : > { %v360_v61 = vmul.f32 %v806_v0, %v322_v45  ;;  %520 = vst.msk [vmem:[%s842_s8 + $0x20] sm:$0xff] %vm515_vm0, %v487_v53  ;;  %521 = vst.msk [vmem:[%s842_s8 + $0x28] sm:$0xff] %vm515_vm0, %v488_v54  ;;  %v490_v63 = vadd.f32 %v458_v48, %v426_v55  ;;  %v397_v4 = vadd.f32 %v808_v1, %v359_v56  ;;  %v463_v22 = vld [vmem:[%s816_s5 + $0x60] sm:$0xff]  ;;  %v464_v23 = vld [vmem:[%s816_s5 + $0x68] sm:$0xff] }
  0x1d   : > { %v361_v5 = vmul.f32 %v806_v0, %v323_v51  ;;  %v362_v6 = vmul.f32 %v806_v0, %v324_v52  ;;  %522 = vst.msk [vmem:[%s842_s8 + $0x30] sm:$0xff] %vm515_vm0, %v489_v58  ;;  %v427_v7 = vmax.f32 %v395_v59, 0.0  ;;  %v428_v8 = vmax.f32 %v396_v60, 0.0  ;;  %v329_v25 = vld [vmem:[%s801_s25 + $0x90] sm:$0xff]  ;;  %v330_v31 = vld [vmem:[%s801_s25 + $0x98] sm:$0xff]  ;;  %v331_v37 = vld [vmem:[%s801_s25 + $0xa0] sm:$0xff] }
  0x1e   : > { %v398_v10 = vadd.f32 %v808_v1, %v360_v61  ;;  %v363_v11 = vmul.f32 %v806_v0, %v325_v57  ;;  %523 = vst.msk [vmem:[%s842_s8 + $0x38] sm:$0xff] %vm515_vm0, %v490_v63  ;;  %v429_v12 = vmax.f32 %v397_v4, 0.0  ;;  %v364_v16 = vmul.f32 %v806_v0, %v326_v62  ;;  %v465_v29 = vld [vmem:[%s816_s5 + $0x70] sm:$0xff]  ;;  %v466_v34 = vld [vmem:[%s816_s5 + $0x78] sm:$0xff]  ;;  %v332_v38 = vld [vmem:[%s801_s25 + $0xa8] sm:$0xff] }
  0x1f   : > { %v399_v14 = vadd.f32 %v808_v1, %v361_v5  ;;  %v400_v15 = vadd.f32 %v808_v1, %v362_v6  ;;  %v491_v19 = vadd.f32 %v459_v2, %v427_v7  ;;  %v492_v20 = vadd.f32 %v460_v3, %v428_v8  ;;  %v333_v43 = vld [vmem:[%s801_s25 + $0xb0] sm:$0xff]  ;;  %v334_v48 = vld [vmem:[%s801_s25 + $0xb8] sm:$0xff]  ;;  %v467_v50 = vld [vmem:[%s816_s5 + $0x80] sm:$0xff] }
  0x20   : > { %v430_v21 = vmax.f32 %v398_v10, 0.0  ;;  %v401_v24 = vadd.f32 %v808_v1, %v363_v11  ;;  %v493_v26 = vadd.f32 %v461_v9, %v429_v12  ;;  %v402_v30 = vadd.f32 %v808_v1, %v364_v16  ;;  %v468_v51 = vld [vmem:[%s816_s5 + $0x88] sm:$0xff]  ;;  %v469_v57 = vld [vmem:[%s816_s5 + $0x90] sm:$0xff]  ;;  %v470_v61 = vld [vmem:[%s816_s5 + $0x98] sm:$0xff] }
  0x21   : > { %v431_v27 = vmax.f32 %v399_v14, 0.0  ;;  %v432_v28 = vmax.f32 %v400_v15, 0.0  ;;  %524 = vst.msk [vmem:[%s842_s8 + $0x40] sm:$0xff] %vm515_vm0, %v491_v19  ;;  %525 = vst.msk [vmem:[%s842_s8 + $0x48] sm:$0xff] %vm515_vm0, %v492_v20  ;;  %v365_v35 = vmul.f32 %v806_v0, %v327_v17  ;;  %v366_v36 = vmul.f32 %v806_v0, %v328_v18  ;;  %v335_v3 = vld [vmem:[%s801_s25 + $0xc0] sm:$0xff]  ;;  %v336_v4 = vld [vmem:[%s801_s25 + $0xc8] sm:$0xff] }
  0x22   : > { %v494_v32 = vadd.f32 %v462_v13, %v430_v21  ;;  %v433_v33 = vmax.f32 %v401_v24, 0.0  ;;  %526 = vst.msk [vmem:[%s842_s8 + $0x50] sm:$0xff] %vm515_vm0, %v493_v26  ;;  %v434_v41 = vmax.f32 %v402_v30, 0.0  ;;  %v367_v42 = vmul.f32 %v806_v0, %v329_v25  ;;  %v471_v8 = vld [vmem:[%s816_s5 + $0xa0] sm:$0xff]  ;;  %v472_v9 = vld [vmem:[%s816_s5 + $0xa8] sm:$0xff]  ;;  %v337_v11 = vld [vmem:[%s801_s25 + $0xd0] sm:$0xff] }
  0x23   : > { %v495_v39 = vadd.f32 %v463_v22, %v431_v27  ;;  %v496_v40 = vadd.f32 %v464_v23, %v432_v28  ;;  %v403_v45 = vadd.f32 %v808_v1, %v365_v35  ;;  %v404_v46 = vadd.f32 %v808_v1, %v366_v36  ;;  %v473_v15 = vld [vmem:[%s816_s5 + $0xb0] sm:$0xff]  ;;  %v338_v17 = vld [vmem:[%s801_s25 + $0xd8] sm:$0xff]  ;;  %v339_v23 = vld [vmem:[%s801_s25 + $0xe0] sm:$0xff] }
  0x24   : > { %527 = vst.msk [vmem:[%s842_s8 + $0x58] sm:$0xff] %vm515_vm0, %v494_v32  ;;  %v497_v44 = vadd.f32 %v465_v29, %v433_v33  ;;  %v368_v47 = vmul.f32 %v806_v0, %v330_v31  ;;  %v498_v49 = vadd.f32 %v466_v34, %v434_v41  ;;  %v405_v52 = vadd.f32 %v808_v1, %v367_v42  ;;  %v474_v20 = vld [vmem:[%s816_s5 + $0xb8] sm:$0xff]  ;;  %v340_v24 = vld [vmem:[%s801_s25 + $0xe8] sm:$0xff]  ;;  %v341_v29 = vld [vmem:[%s801_s25 + $0xf0] sm:$0xff] }
  0x25   : > { %528 = vst.msk [vmem:[%s842_s8 + $0x60] sm:$0xff] %vm515_vm0, %v495_v39  ;;  %529 = vst.msk [vmem:[%s842_s8 + $0x68] sm:$0xff] %vm515_vm0, %v496_v40  ;;  %v369_v53 = vmul.f32 %v806_v0, %v331_v37  ;;  %v370_v54 = vmul.f32 %v806_v0, %v332_v38  ;;  %v435_v55 = vmax.f32 %v403_v45, 0.0  ;;  %v436_v56 = vmax.f32 %v404_v46, 0.0  ;;  %v342_v34 = vld [vmem:[%s801_s25 + $0xf8] sm:$0xff]  ;;  %v475_v36 = vld [vmem:[%s816_s5 + $0xc0] sm:$0xff] }
  0x26   : > { %530 = vst.msk [vmem:[%s842_s8 + $0x70] sm:$0xff] %vm515_vm0, %v497_v44  ;;  %v406_v58 = vadd.f32 %v808_v1, %v368_v47  ;;  %v371_v59 = vmul.f32 %v806_v0, %v333_v43  ;;  %531 = vst.msk [vmem:[%s842_s8 + $0x78] sm:$0xff] %vm515_vm0, %v498_v49  ;;  %v437_v60 = vmax.f32 %v405_v52, 0.0  ;;  %v372_v2 = vmul.f32 %v806_v0, %v334_v48  ;;  %v476_v37 = vld [vmem:[%s816_s5 + $0xc8] sm:$0xff]  ;;  %v477_v43 = vld [vmem:[%s816_s5 + $0xd0] sm:$0xff] }
  0x27   : > { %v407_v62 = vadd.f32 %v808_v1, %v369_v53  ;;  %v408_v63 = vadd.f32 %v808_v1, %v370_v54  ;;  %v499_v5 = vadd.f32 %v467_v50, %v435_v55  ;;  %v500_v6 = vadd.f32 %v468_v51, %v436_v56  ;;  %v478_v47 = vld [vmem:[%s816_s5 + $0xd8] sm:$0xff]  ;;  %v479_v54 = vld [vmem:[%s816_s5 + $0xe0] sm:$0xff]  ;;  %v480_v55 = vld [vmem:[%s816_s5 + $0xe8] sm:$0xff] }
  0x28   : > { %v438_v7 = vmax.f32 %v406_v58, 0.0  ;;  %v409_v10 = vadd.f32 %v808_v1, %v371_v59  ;;  %v501_v12 = vadd.f32 %v469_v57, %v437_v60  ;;  %v410_v16 = vadd.f32 %v808_v1, %v372_v2  ;;  %v481_v60 = vld [vmem:[%s816_s5 + $0xf0] sm:$0xff] }
  0x29   : > { %v439_v13 = vmax.f32 %v407_v62, 0.0  ;;  %v440_v14 = vmax.f32 %v408_v63, 0.0  ;;  %532 = vst.msk [vmem:[%s842_s8 + $0x80] sm:$0xff] %vm515_vm0, %v499_v5  ;;  %533 = vst.msk [vmem:[%s842_s8 + $0x88] sm:$0xff] %vm515_vm0, %v500_v6  ;;  %v373_v21 = vmul.f32 %v806_v0, %v335_v3  ;;  %v374_v22 = vmul.f32 %v806_v0, %v336_v4  ;;  %v482_v63 = vld [vmem:[%s816_s5 + $0xf8] sm:$0xff] }
  0x2a   : > { %v502_v18 = vadd.f32 %v470_v61, %v438_v7  ;;  %v441_v19 = vmax.f32 %v409_v10, 0.0  ;;  %534 = vst.msk [vmem:[%s842_s8 + $0x90] sm:$0xff] %vm515_vm0, %v501_v12  ;;  %v442_v27 = vmax.f32 %v410_v16, 0.0  ;;  %v375_v28 = vmul.f32 %v806_v0, %v337_v11 }
  0x2b   : > { %v503_v25 = vadd.f32 %v471_v8, %v439_v13  ;;  %v504_v26 = vadd.f32 %v472_v9, %v440_v14  ;;  %v411_v31 = vadd.f32 %v808_v1, %v373_v21  ;;  %v412_v32 = vadd.f32 %v808_v1, %v374_v22 }
  0x2c   : > { %535 = vst.msk [vmem:[%s842_s8 + $0x98] sm:$0xff] %vm515_vm0, %v502_v18  ;;  %v505_v30 = vadd.f32 %v473_v15, %v441_v19  ;;  %v376_v33 = vmul.f32 %v806_v0, %v338_v17  ;;  %v506_v35 = vadd.f32 %v474_v20, %v442_v27  ;;  %v413_v38 = vadd.f32 %v808_v1, %v375_v28 }
  0x2d   : > { %536 = vst.msk [vmem:[%s842_s8 + $0xa0] sm:$0xff] %vm515_vm0, %v503_v25  ;;  %537 = vst.msk [vmem:[%s842_s8 + $0xa8] sm:$0xff] %vm515_vm0, %v504_v26  ;;  %v377_v39 = vmul.f32 %v806_v0, %v339_v23  ;;  %v378_v40 = vmul.f32 %v806_v0, %v340_v24  ;;  %v443_v41 = vmax.f32 %v411_v31, 0.0  ;;  %v444_v42 = vmax.f32 %v412_v32, 0.0 }
  0x2e   : > { %538 = vst.msk [vmem:[%s842_s8 + $0xb0] sm:$0xff] %vm515_vm0, %v505_v30  ;;  %v414_v44 = vadd.f32 %v808_v1, %v376_v33  ;;  %v379_v45 = vmul.f32 %v806_v0, %v341_v29  ;;  %539 = vst.msk [vmem:[%s842_s8 + $0xb8] sm:$0xff] %vm515_vm0, %v506_v35  ;;  %v445_v46 = vmax.f32 %v413_v38, 0.0  ;;  %v380_v50 = vmul.f32 %v806_v0, %v342_v34 }
  0x2f   : > { %v415_v48 = vadd.f32 %v808_v1, %v377_v39  ;;  %v416_v49 = vadd.f32 %v808_v1, %v378_v40  ;;  %v507_v51 = vadd.f32 %v475_v36, %v443_v41  ;;  %v508_v52 = vadd.f32 %v476_v37, %v444_v42 }
  0x30   : > { %v446_v53 = vmax.f32 %v414_v44, 0.0  ;;  %v417_v56 = vadd.f32 %v808_v1, %v379_v45  ;;  %v509_v57 = vadd.f32 %v477_v43, %v445_v46  ;;  %v418_v61 = vadd.f32 %v808_v1, %v380_v50 }
  0x31   : > { %v447_v58 = vmax.f32 %v415_v48, 0.0  ;;  %v448_v59 = vmax.f32 %v416_v49, 0.0  ;;  %540 = vst.msk [vmem:[%s842_s8 + $0xc0] sm:$0xff] %vm515_vm0, %v507_v51  ;;  %541 = vst.msk [vmem:[%s842_s8 + $0xc8] sm:$0xff] %vm515_vm0, %v508_v52 }
  0x32   : > { %v510_v0 = vadd.f32 %v478_v47, %v446_v53  ;;  %v449_v62 = vmax.f32 %v417_v56, 0.0  ;;  %542 = vst.msk [vmem:[%s842_s8 + $0xd0] sm:$0xff] %vm515_vm0, %v509_v57  ;;  %v450_v4 = vmax.f32 %v418_v61, 0.0 }
  0x33   : > { %v511_v2 = vadd.f32 %v479_v54, %v447_v58  ;;  %v512_v3 = vadd.f32 %v480_v55, %v448_v59 }
  0x34   : > { %543 = vst.msk [vmem:[%s842_s8 + $0xd8] sm:$0xff] %vm515_vm0, %v510_v0  ;;  %v513_v5 = vadd.f32 %v481_v60, %v449_v62  ;;  %v514_v1 = vadd.f32 %v482_v63, %v450_v4 }
  0x35   : > { %544 = vst.msk [vmem:[%s842_s8 + $0xe0] sm:$0xff] %vm515_vm0, %v511_v2  ;;  %545 = vst.msk [vmem:[%s842_s8 + $0xe8] sm:$0xff] %vm515_vm0, %v512_v3 }
  0x36   : > { %546 = vst.msk [vmem:[%s842_s8 + $0xf0] sm:$0xff] %vm515_vm0, %v513_v5  ;;  %547 = vst.msk [vmem:[%s842_s8 + $0xf8] sm:$0xff] %vm515_vm0, %v514_v1 }
  0x37 PF: > { %s14_s17 = sadd.s32 1, %s747_s17   ;;  %s1028_s15 = smov %s743_s16 }
  0x38   : > { %p11_p5 = scmp.ge.s32.totalorder %s14_s17, 4   ;;  %s1029_s16 = smov %s1031_s18 }
  0x3a   :  { %13 = sbr.rel (!%p11_p5) target bundleno = 2 (0x2), region = 75 }

// kernel: resblock_reverse_forward.7
= control target key start
LH: loop header
LB: loop body
LE: loop exit
PB: predicated region body
PF: predicated region fallthrough
CT: control target
= control target key end

     0   :  { %s583_s12 = smov 0   ;;  %s585_s13 = smov 0   ;;  %s790_s0 = inlined_call_operand.vmem [shape: f32[2,16,16,4], index: 0, kind: input, shape index: {}]   ;;  %s791_s1 = inlined_call_operand.vmem [shape: f32[2,1,4], index: 1, kind: input, shape index: {}]   ;;  %s792_s2 = inlined_call_operand.vmem [shape: f32[2,1,4], index: 2, kind: input, shape index: {}]   ;;  %s793_s3 = inlined_call_operand.vmem [shape: f32[2,16,16,4], index: 3, kind: output, shape index: {}]  }
   0x1   :  { %s587_s14 = smov 0  }
   0x2 LB: > { %s25_s15 = sadd.s32 1, %s557_s13  ;;  %p504_p0 = scmp.ge.s32.totalorder %s561_s14, 1  ;;  %s561_s14 = sphi %s587_s14, %s13_s14   ;;  %s557_s13 = sphi %s585_s13, %s795_s13   ;;  %s553_s12 = sphi %s583_s12, %s794_s12  }
   0x3   : > { %p27_p1 = scmp.ge.s32.totalorder %s25_s15, 2  ;;  %p175_p2 = scmp.lt.s32.totalorder %s561_s14, 3 }
   0x5   : > { %s797_s15 = smov (%p27_p1, %s25_s15), 0  ;;  %p176_p3 = pnand %p504_p0, %p175_p2 }
   0x6   : > { %p216_p4 = scmp.lt.s32.totalorder (!%p176_p3), %s553_s12, 1  ;;  %vm353_vm0 = vcmask (!%p176_p3), 31744  }
   0x7   : > { %179 = sbr.rel (%p176_p3) target bundleno = 41 (0x29), region = 32 }
   0xe   : > { %s799_s12 = smov (!%p216_p4, %s553_s12), 1 }
   0xf   : > { %s513_s16 = sshll.u32 %s799_s12, 8  ;;  %s228_s19 = scalar_lea.vmem %s791_s1, %s799_s12 }
  0x10   : > { %s607_s22 = scalar_lea.vmem %s790_s0, %s513_s16  ;;  %s231_s25 = scalar_lea.vmem %s792_s2, %s799_s12  ;;  %v612_v0 = vld [vmem:[%s228_s19] ss:$0 sm:$0xff] }
  0x11   : > { %v614_v1 = vld [vmem:[%s231_s25] ss:$0 sm:$0xff]  ;;  %v246_v3 = vld [vmem:[%s607_s22 + $0x8] sm:$0xff]  ;;  %v247_v6 = vld [vmem:[%s607_s22 + $0x10] sm:$0xff]  ;;  %s626_s28 = scalar_lea.vmem %s793_s3, %s513_s16 }
  0x12   : > { %v245_v2 = vld [vmem:[%s607_s22] sm:$0xff]  ;;  %v284_v5 = vmul.f32 %v612_v0, %v246_v3  ;;  %v248_v7 = vld [vmem:[%s607_s22 + $0x18] sm:$0xff]  ;;  %v285_v9 = vmul.f32 %v612_v0, %v247_v6  ;;  %v250_v12 = vld [vmem:[%s607_s22 + $0x28] sm:$0xff] }
  0x13   : > { %v283_v4 = vmul.f32 %v612_v0, %v245_v2  ;;  %v249_v8 = vld [vmem:[%s607_s22 + $0x20] sm:$0xff]  ;;  %v286_v10 = vmul.f32 %v612_v0, %v248_v7  ;;  %v251_v13 = vld [vmem:[%s607_s22 + $0x30] sm:$0xff]  ;;  %v252_v14 = vld [vmem:[%s607_s22 + $0x38] sm:$0xff]  ;;  %v288_v17 = vmul.f32 %v612_v0, %v250_v12 }
  0x14   : > { %v287_v11 = vmul.f32 %v612_v0, %v249_v8  ;;  %v322_v16 = vadd.f32 %v614_v1, %v284_v5  ;;  %v289_v18 = vmul.f32 %v612_v0, %v251_v13  ;;  %v253_v19 = vld [vmem:[%s607_s22 + $0x40] sm:$0xff]  ;;  %v254_v20 = vld [vmem:[%s607_s22 + $0x48] sm:$0xff]  ;;  %v255_v21 = vld [vmem:[%s607_s22 + $0x50] sm:$0xff]  ;;  %v323_v22 = vadd.f32 %v614_v1, %v285_v9 }
  0x15   : > { %v321_v15 = vadd.f32 %v614_v1, %v283_v4  ;;  %v324_v23 = vadd.f32 %v614_v1, %v286_v10  ;;  %v290_v25 = vmul.f32 %v612_v0, %v252_v14  ;;  %v256_v26 = vld [vmem:[%s607_s22 + $0x58] sm:$0xff]  ;;  %v257_v27 = vld [vmem:[%s607_s22 + $0x60] sm:$0xff]  ;;  %v258_v28 = vld [vmem:[%s607_s22 + $0x68] sm:$0xff]  ;;  %v326_v29 = vadd.f32 %v614_v1, %v288_v17 }
  0x16   : > { %v325_v24 = vadd.f32 %v614_v1, %v287_v11  ;;  %355 = vst.msk [vmem:[%s626_s28 + $0x8] sm:$0xff] %vm353_vm0, %v322_v16  ;;  %v327_v30 = vadd.f32 %v614_v1, %v289_v18  ;;  %v291_v31 = vmul.f32 %v612_v0, %v253_v19  ;;  %v292_v32 = vmul.f32 %v612_v0, %v254_v20  ;;  %v259_v33 = vld [vmem:[%s607_s22 + $0x70] sm:$0xff]  ;;  %v260_v34 = vld [vmem:[%s607_s22 + $0x78] sm:$0xff]  ;;  %v261_v39 = vld [vmem:[%s607_s22 + $0x80] sm:$0xff] }
  0x17   : > { %354 = vst.msk [vmem:[%s626_s28] sm:$0xff] %vm353_vm0, %v321_v15  ;;  %356 = vst.msk [vmem:[%s626_s28 + $0x10] sm:$0xff] %vm353_vm0, %v323_v22  ;;  %v328_v35 = vadd.f32 %v614_v1, %v290_v25  ;;  %v293_v36 = vmul.f32 %v612_v0, %v255_v21  ;;  %v294_v37 = vmul.f32 %v612_v0, %v256_v26  ;;  %v262_v40 = vld [vmem:[%s607_s22 + $0x88] sm:$0xff]  ;;  %v263_v45 = vld [vmem:[%s607_s22 + $0x90] sm:$0xff] }
  0x18   : > { %357 = vst.msk [vmem:[%s626_s28 + $0x18] sm:$0xff] %vm353_vm0, %v324_v23  ;;  %358 = vst.msk [vmem:[%s626_s28 + $0x20] sm:$0xff] %vm353_vm0, %v325_v24  ;;  %v295_v38 = vmul.f32 %v612_v0, %v257_v27  ;;  %v329_v41 = vadd.f32 %v614_v1, %v291_v31  ;;  %v330_v42 = vadd.f32 %v614_v1, %v292_v32  ;;  %v264_v46 = vld [vmem:[%s607_s22 + $0x98] sm:$0xff]  ;;  %v265_v47 = vld [vmem:[%s607_s22 + $0xa0] sm:$0xff] }
  0x19   : > { %359 = vst.msk [vmem:[%s626_s28 + $0x28] sm:$0xff] %vm353_vm0, %v326_v29  ;;  %360 = vst.msk [vmem:[%s626_s28 + $0x30] sm:$0xff] %vm353_vm0, %v327_v30  ;;  %v296_v43 = vmul.f32 %v612_v0, %v258_v28  ;;  %v297_v44 = vmul.f32 %v612_v0, %v259_v33  ;;  %v331_v48 = vadd.f32 %v614_v1, %v293_v36  ;;  %v266_v52 = vld [vmem:[%s607_s22 + $0xa8] sm:$0xff]  ;;  %v267_v53 = vld [vmem:[%s607_s22 + $0xb0] sm:$0xff] }
  0x1a   : > { %361 = vst.msk [vmem:[%s626_s28 + $0x38] sm:$0xff] %vm353_vm0, %v328_v35  ;;  %v332_v49 = vadd.f32 %v614_v1, %v294_v37  ;;  %v333_v50 = vadd.f32 %v614_v1, %v295_v38  ;;  %v298_v51 = vmul.f32 %v612_v0, %v260_v34  ;;  %362 = vst.msk [vmem:[%s626_s28 + $0x40] sm:$0xff] %vm353_vm0, %v329_v41  ;;  %v268_v58 = vld [vmem:[%s607_s22 + $0xb8] sm:$0xff]  ;;  %v269_v63 = vld [vmem:[%s607_s22 + $0xc0] sm:$0xff] }
  0x1b   : > { %363 = vst.msk [vmem:[%s626_s28 + $0x48] sm:$0xff] %vm353_vm0, %v330_v42  ;;  %v334_v54 = vadd.f32 %v614_v1, %v296_v43  ;;  %v335_v55 = vadd.f32 %v614_v1, %v297_v44  ;;  %v299_v56 = vmul.f32 %v612_v0, %v261_v39  ;;  %v300_v57 = vmul.f32 %v612_v0, %v262_v40  ;;  %v270_v2 = vld [vmem:[%s607_s22 + $0xc8] sm:$0xff]  ;;  %v271_v7 = vld [vmem:[%s607_s22 + $0xd0] sm:$0xff]  ;;  %v272_v8 = vld [vmem:[%s607_s22 + $0xd8] sm:$0xff] }
  0x1c   : > { %364 = vst.msk [vmem:[%s626_s28 + $0x50] sm:$0xff] %vm353_vm0, %v331_v48  ;;  %365 = vst.msk [vmem:[%s626_s28 + $0x58] sm:$0xff] %vm353_vm0, %v332_v49  ;;  %v336_v59 = vadd.f32 %v614_v1, %v298_v51  ;;  %v301_v60 = vmul.f32 %v612_v0, %v263_v45  ;;  %v302_v61 = vmul.f32 %v612_v0, %v264_v46  ;;  %v273_v9 = vld [vmem:[%s607_s22 + $0xe0] sm:$0xff]  ;;  %v274_v14 = vld [vmem:[%s607_s22 + $0xe8] sm:$0xff] }
  0x1d   : > { %366 = vst.msk [vmem:[%s626_s28 + $0x60] sm:$0xff] %vm353_vm0, %v333_v50  ;;  %v303_v62 = vmul.f32 %v612_v0, %v265_v47  ;;  %367 = vst.msk [vmem:[%s626_s28 + $0x68] sm:$0xff] %vm353_vm0, %v334_v54  ;;  %v337_v3 = vadd.f32 %v614_v1, %v299_v56  ;;  %v338_v4 = vadd.f32 %v614_v1, %v300_v57  ;;  %v275_v15 = vld [vmem:[%s607_s22 + $0xf0] sm:$0xff]  ;;  %v276_v20 = vld [vmem:[%s607_s22 + $0xf8] sm:$0xff] }
  0x1e   : > { %368 = vst.msk [vmem:[%s626_s28 + $0x70] sm:$0xff] %vm353_vm0, %v335_v55  ;;  %v304_v5 = vmul.f32 %v612_v0, %v266_v52  ;;  %v305_v6 = vmul.f32 %v612_v0, %v267_v53  ;;  %369 = vst.msk [vmem:[%s626_s28 + $0x78] sm:$0xff] %vm353_vm0, %v336_v59  ;;  %v339_v10 = vadd.f32 %v614_v1, %v301_v60 }
  0x1f   : > { %v340_v11 = vadd.f32 %v614_v1, %v302_v61  ;;  %v341_v12 = vadd.f32 %v614_v1, %v303_v62  ;;  %v306_v13 = vmul.f32 %v612_v0, %v268_v58  ;;  %370 = vst.msk [vmem:[%s626_s28 + $0x80] sm:$0xff] %vm353_vm0, %v337_v3  ;;  %371 = vst.msk [vmem:[%s626_s28 + $0x88] sm:$0xff] %vm353_vm0, %v338_v4 }
  0x20   : > { %v342_v16 = vadd.f32 %v614_v1, %v304_v5  ;;  %v343_v17 = vadd.f32 %v614_v1, %v305_v6  ;;  %v307_v18 = vmul.f32 %v612_v0, %v269_v63  ;;  %v308_v19 = vmul.f32 %v612_v0, %v270_v2  ;;  %372 = vst.msk [vmem:[%s626_s28 + $0x90] sm:$0xff] %vm353_vm0, %v339_v10 }
  0x21   : > { %373 = vst.msk [vmem:[%s626_s28 + $0x98] sm:$0xff] %vm353_vm0, %v340_v11  ;;  %374 = vst.msk [vmem:[%s626_s28 + $0xa0] sm:$0xff] %vm353_vm0, %v341_v12  ;;  %v344_v21 = vadd.f32 %v614_v1, %v306_v13  ;;  %v309_v22 = vmul.f32 %v612_v0, %v271_v7  ;;  %v310_v23 = vmul.f32 %v612_v0, %v272_v8 }
  0x22   : > { %v311_v24 = vmul.f32 %v612_v0, %v273_v9  ;;  %375 = vst.msk [vmem:[%s626_s28 + $0xa8] sm:$0xff] %vm353_vm0, %v342_v16  ;;  %376 = vst.msk [vmem:[%s626_s28 + $0xb0] sm:$0xff] %vm353_vm0, %v343_v17  ;;  %v345_v25 = vadd.f32 %v614_v1, %v307_v18  ;;  %v346_v26 = vadd.f32 %v614_v1, %v308_v19 }
  0x23   : > { %v312_v27 = vmul.f32 %v612_v0, %v274_v14  ;;  %v313_v28 = vmul.f32 %v612_v0, %v275_v15  ;;  %377 = vst.msk [vmem:[%s626_s28 + $0xb8] sm:$0xff] %vm353_vm0, %v344_v21  ;;  %v347_v29 = vadd.f32 %v614_v1, %v309_v22  ;;  %v348_v30 = vadd.f32 %v614_v1, %v310_v23 }
  0x24   : > { %v349_v31 = vadd.f32 %v614_v1, %v311_v24  ;;  %v314_v32 = vmul.f32 %v612_v0, %v276_v20  ;;  %378 = vst.msk [vmem:[%s626_s28 + $0xc0] sm:$0xff] %vm353_vm0, %v345_v25  ;;  %379 = vst.msk [vmem:[%s626_s28 + $0xc8] sm:$0xff] %vm353_vm0, %v346_v26 }
  0x25   : > { %v350_v33 = vadd.f32 %v614_v1, %v312_v27  ;;  %v351_v34 = vadd.f32 %v614_v1, %v313_v28  ;;  %380 = vst.msk [vmem:[%s626_s28 + $0xd0] sm:$0xff] %vm353_vm0, %v347_v29  ;;  %381 = vst.msk [vmem:[%s626_s28 + $0xd8] sm:$0xff] %vm353_vm0, %v348_v30 }
  0x26   : > { %382 = vst.msk [vmem:[%s626_s28 + $0xe0] sm:$0xff] %vm353_vm0, %v349_v31  ;;  %v352_v35 = vadd.f32 %v614_v1, %v314_v32 }
  0x27   : > { %383 = vst.msk [vmem:[%s626_s28 + $0xe8] sm:$0xff] %vm353_vm0, %v350_v33  ;;  %384 = vst.msk [vmem:[%s626_s28 + $0xf0] sm:$0xff] %vm353_vm0, %v351_v34 }
  0x28   : > { %385 = vst.msk [vmem:[%s626_s28 + $0xf8] sm:$0xff] %vm353_vm0, %v352_v35 }
  0x29 PF: > { %s13_s14 = sadd.s32 1, %s561_s14   ;;  %s794_s12 = smov %s557_s13 }
  0x2a   : > { %p10_p5 = scmp.ge.s32.totalorder %s13_s14, 4   ;;  %s795_s13 = smov %s797_s15 }
  0x2c   :  { %12 = sbr.rel (!%p10_p5) target bundleno = 2 (0x2), region = 68 }

// kernel: resblock_reverse_forward.6
= control target key start
LH: loop header
LB: loop body
LE: loop exit
PB: predicated region body
PF: predicated region fallthrough
CT: control target
= control target key end

     0   :  { %s924_s15 = smov 0   ;;  %s926_s16 = smov 0   ;;  %s1043_s0 = inlined_call_operand.vmem [shape: f32[2,16,16,16], index: 0, kind: input, shape index: {}]   ;;  %s1044_s1 = inlined_call_operand.vmem [shape: f32[4,16,4], index: 1, kind: input, shape index: {}]   ;;  %s1045_s2 = inlined_call_operand.vmem [shape: f32[1,4], index: 2, kind: input, shape index: {}]   ;;  %s1046_s3 = inlined_call_operand.vmem [shape: f32[2,16,16,4], index: 3, kind: output, shape index: {0}]   ;;  %s1047_s4 = inlined_call_operand.vmem [shape: f32[2,2,128], index: 4, kind: output, shape index: {1}]  }
   0x1   :  { %s928_s17 = smov 0   ;;  %s930_s18 = smov 0  }
   0x2   :  { %s932_s19 = smov 0   ;;  %s934_s20 = smov 0  }
   0x3   :  { %s936_s21 = smov 0  }
   0x4 LB: > { %s27_s22 = sadd.s32 1, %s884_s18  ;;  %s30_s23 = sadd.s32 1, %s888_s19  ;;  %s896_s21 = sphi %s936_s21, %s15_s21   ;;  %s892_s20 = sphi %s934_s20, %s1057_s20   ;;  %s888_s19 = sphi %s932_s19, %s1056_s19   ;;  %s884_s18 = sphi %s930_s18, %s1055_s18   ;;  %s880_s17 = sphi %s928_s17, %s1054_s17   ;;  %s876_s16 = sphi %s926_s16, %s1053_s16   ;;  %s872_s15 = sphi %s924_s15, %s1052_s15  }
   0x5   : > { %p28_p0 = scmp.ge.s32.totalorder %s27_s22, 2  ;;  %p711_p1 = scmp.ge.s32.totalorder %s896_s21, 1 }
   0x6   : > { %p216_p2 = scmp.lt.s32.totalorder %s896_s21, 65  ;;  %s34_s24 = sadd.s32 1, %s892_s20 }
   0x7   : > { %s1059_s22 = smov (%p28_p0, %s27_s22), 0  ;;  %s1061_s23 = smov (!%p28_p0, %s30_s23), %s888_s19 }
   0x8   : > { %p217_p3 = pnand %p711_p1, %p216_p2  ;;  %p32_p4 = scmp.ge.s32.totalorder %s1061_s23, 16 }
   0x9   : > { %s260_s25 = sadd.s32 (!%p217_p3), %s872_s15, %s876_s16  ;;  %p266_p6 = scmp.lt.s32.totalorder (!%p217_p3), %s880_s17, 1 }
   0xa   : > { %s1063_s23 = smov (%p32_p4, %s1061_s23), 0  ;;  %s1065_s24 = smov (!%p32_p4, %s34_s24), %s892_s20 }
   0xb   : > { %1048 = sst [smem:[#allocation2_spill]] %s1063_s23  ;;  %p36_p5 = scmp.ge.s32.totalorder %s1065_s24, 2 }
   0xc   : > { %220 = sbr.rel (%p217_p3) target bundleno = 494 (0x1ee), region = 32  ;;  %s972_s26 = sadd.s32 (!%p217_p3), 4294967295, %s260_s25 }
   0xd   : > { %s1067_s24 = smov (%p36_p5, %s1065_s24), 0  ;;  %p283_p7 = scmp.lt.s32.totalorder (!%p217_p3), %s876_s16, 15 }
   0xe   : > { %1049 = sst [smem:[#allocation3_spill]] %s1067_s24  ;;  %p262_p8 = scmp.lt.s32.totalorder (!%p217_p3), %s972_s26, 15 }
   0xf   : > { %p712_p9 = scmp.gt.s32.totalorder (!%p217_p3), %s972_s26, 0  ;;  %p294_p11 = scmp.eq.s32.totalorder (!%p217_p3), %s876_s16, 0 }
  0x10   : > { %p295_p12 = scmp.eq.s32.totalorder (!%p217_p3), %s872_s15, 0 }
  0x12   : > { %p296_p13 = pnand (!%p217_p3), %p295_p12, %p294_p11 }
  0x13   : > { %s1069_s17 = smov (!%p266_p6, %s880_s17), 1  ;;  %v898_v0 = vmov (!%p296_p13), 0.0  }
  0x14   : > { %s263_s27 = scalar_select %p262_p8, %s972_s26, 15 }
  0x15   : > { %s718_s28 = sshll.u32 %s1069_s17, 5  ;;  %s723_s29 = sshll.u32 %s1069_s17, 1 }
  0x16   : > { %s1071_s27 = smov (!%p712_p9, %s263_s27), 0  ;;  %s982_s7 = scalar_lea.vmem %s1047_s4, %s723_s29 }
  0x17   : > { %s284_s30 = scalar_select %p283_p7, %s876_s16, 15 }
  0x18   : > { %p268_p10 = scmp.lt.s32.totalorder %s1071_s27, 15  ;;  %299 = sbr.rel (%p296_p13) target bundleno = 31 (0x1f), region = 36  ;;  %300 = vst [vmem:[%s982_s7] sm:$0x3] (!%p296_p13), %v898_v0 }
  0x19   : > { %s720_s8 = sshll.u32 %s284_s30, 1 }
  0x1a   : > { %s1073_s27 = smov (!%p268_p10, %s1071_s27), 15  ;;  %s287_s9 = sadd.s32 %s720_s8, %s718_s28 }
  0x1b   : > { %s717_s10 = sshll.u32 %s1073_s27, 1  ;;  %s722_s11 = sshll.u32 %s287_s9, 3 }
  0x1c   : > { %s272_s12 = sadd.s32 %s718_s28, %s717_s10  ;;  %s989_s17 = scalar_lea.vmem %s1046_s3, %s722_s11 }
  0x1d   : > { %s719_s25 = sshll.u32 %s272_s12, 3 }
  0x1e   : > { %s274_s29 = scalar_lea.vmem %s1043_s0, %s719_s25 }
  0x1f PF: > { %p724_p0 = scmp.ne.s32.totalorder %s872_s15, 0 }
  0x20   : > { %v725_v1 = vld [vmem:[%s1045_s2] ss:$0 sm:$0xff] (!%p724_p0)  ;;  %vm311_vm0 = vcmask (!%p724_p0), 31744  }
  0x21   : > { %303 = sbr.rel (%p724_p0) target bundleno = 40 (0x28), region = 40  ;;  %312 = vst.msk [vmem:[%s989_s17] sm:$0xff] (!%p724_p0), %vm311_vm0, %v725_v1  ;;  %313 = vst.msk [vmem:[%s989_s17 + $0x8] sm:$0xff] (!%p724_p0), %vm311_vm0, %v725_v1 }
  0x28 PF: > { %p316_p1 = scmp.ge.s32.totalorder %s972_s26, 0  ;;  %p317_p2 = scmp.le.s32.totalorder %s972_s26, 15 }
  0x2a   : > { %p318_p3 = pnand %p317_p2, %p316_p1 }
  0x2b   : > { %s745_s23 = sshll.u32 (!%p318_p3), %s872_s15, 5  ;;  %v322_v2 = vld [vmem:[%s274_s29] sm:$0xff] (!%p318_p3)  ;;  %v323_v3 = vld [vmem:[%s274_s29 + $0x8] sm:$0xff] (!%p318_p3)  ;;  %vm326_vm1 = vcmask (!%p318_p3), 1040384   ;;  %vm337_vm2 = vcmask (!%p318_p3), 130048   ;;  %vm423_vm3 = vcmask (!%p318_p3), 1046528  }
  0x2c   : > { %321 = sbr.rel (%p318_p3) target bundleno = 271 (0x10f), region = 44  ;;  %s334_s30 = scalar_lea.vmem (!%p318_p3), %s1044_s1, %s745_s23  ;;  %v327_v4 = vrot.slane (!%p318_p3), %v322_v2, 7  ;;  %v328_v5 = vrot.slane (!%p318_p3), %v323_v3, 7  ;;  %v509_v21 = vld [vmem:[%s989_s17 + $0x8] sm:$0xff] (!%p318_p3)  ;;  %v508_v25 = vld [vmem:[%s989_s17] sm:$0xff] (!%p318_p3)  ;;  %vm514_vm4 = vcmask (!%p318_p3), 31744  }
  0x2d   : > { %v335_v6 = vld [vmem:[%s334_s30] sm:$0xff] (!%p318_p3)  ;;  %v336_v7 = vld [vmem:[%s334_s30 + $0x8] sm:$0xff] (!%p318_p3)  ;;  %v732_v8 = vld [vmem:[%s334_s30 + $0x10] sm:$0xff] (!%p318_p3) }
  0x2e   : > { %v769_v9 = vpack.c.bf16 (!%p318_p3), %v336_v7, %v335_v6  ;;  %v733_v10 = vld [vmem:[%s334_s30 + $0x18] sm:$0xff] (!%p318_p3)  ;;  %v329_v11 = vsel (!%p318_p3), %vm326_vm1, %v327_v4, %v328_v5  ;;  %v331_v12 = vsel (!%p318_p3), %vm326_vm1, 0.0, %v327_v4  ;;  %v427_v13 = vrot.slane (!%p318_p3), %v328_v5, 1 }
  0x2f   : > { %v773_v14 = vpack.c.bf16 (!%p318_p3), %v733_v10, %v732_v8  ;;  %759 = vmatprep.mubr.msk.f32.mxu1 (!%p318_p3), %vm337_vm2, %v331_v12  ;;  %v424_v15 = vrot.slane (!%p318_p3), %v331_v12, 1  ;;  %v425_v16 = vrot.slane (!%p318_p3), %v329_v11, 1 }
  0x30   : > { %770 = vmatprep.subr.bf16.mxu1 (!%p318_p3), %v769_v9 }
  0x31   : > { %774 = vmatprep.subr.bf16.mxu0 (!%p318_p3), %v773_v14  ;;  %772 = vmatpush3.bf16.msra.mxu1 (!%p318_p3), %v769_v9  ;;  %v426_v17 = vsel (!%p318_p3), %vm423_vm3, %v424_v15, %v425_v16  ;;  %v428_v18 = vsel (!%p318_p3), %vm423_vm3, %v425_v16, %v427_v13 }
  0x32   : > { %776 = vmatpush3.bf16.msra.mxu0 (!%p318_p3), %v773_v14  ;;  %766 = vmatprep.mubr.msk.f32.mxu0 (!%p318_p3), %vm337_vm2, %v426_v17 }
  0x34   : > { %760 = vmatmul.mubr.msk.f32.vlgmr.msra.gmra.mrb[0].mxu1 %vm337_vm2, %v329_v11 }
  0x35   : > { %767 = vmatmul.mubr.msk.f32.vlgmr.msra.gmra.mrb[0].mxu0 %vm337_vm2, %v428_v18 }
 0x107   : > { %v761_v19 = vpop.f32.mrb[0].mxu1 }
 0x108   : > { %v768_v20 = vpop.f32.mrb[0].mxu0  ;;  %v409_v22 = vpop.f32.mrb[1].mxu1 }
 0x109   : > { %v777_v23 = vadd.f32 %v768_v20, %v761_v19  ;;  %v499_v24 = vpop.f32.mrb[1].mxu0 }
 0x10a   : > { %v779_v26 = vadd.f32 %v499_v24, %v409_v22 }
 0x10b   : > { %v778_v27 = vadd.f32 %v777_v23, %v509_v21 }
 0x10c   : > { %v780_v28 = vadd.f32 %v779_v26, %v508_v25 }
 0x10d   : > { %516 = vst.msk [vmem:[%s989_s17 + $0x8] sm:$0xff] %vm514_vm4, %v778_v27 }
 0x10e   : > { %515 = vst.msk [vmem:[%s989_s17] sm:$0xff] %vm514_vm4, %v780_v28 }
 0x10f PF: > { %p736_p4 = scmp.ne.s32.totalorder %s872_s15, 1 }
 0x110   : > { %vm523_vm5 = vcmask (!%p736_p4), 31744   ;;  %v550_v53 = vlaneseq (!%p736_p4)  ;;  %v552_v55 = vld [vmem:[%s982_s7] sm:$0x3] (!%p736_p4) }
 0x111   : > { %520 = sbr.rel (%p736_p4) target bundleno = 494 (0x1ee), region = 48 }
 0x112   : > { %v551_v54 = vshrl.u32 (!%p736_p4), %v550_v53, 7 }
 0x114   : > { %v522_v30 = vld [vmem:[%s989_s17 + $0x8] sm:$0xff] (!%p736_p4)  ;;  %vm553_vm6 = vcmp.eq.s32.totalorder (!%p736_p4), %v551_v54, 0 }
 0x115   : > { %v521_v29 = vld [vmem:[%s989_s17] sm:$0xff] (!%p736_p4)  ;;  %v525_v32 = vsel (!%p736_p4), %vm523_vm5, %v522_v30, 0.0  ;;  %v537_v34 = vmul.f32 (!%p736_p4), %v522_v30, %v522_v30 }
 0x116   : > { %v524_v31 = vsel (!%p736_p4), %vm523_vm5, %v521_v29, 0.0  ;;  %v536_v33 = vmul.f32 (!%p736_p4), %v521_v29, %v521_v29 }
 0x117   : > { %v526_v35 = vadd.f32 (!%p736_p4), %v525_v32, %v524_v31  ;;  %v539_v37 = vsel (!%p736_p4), %vm523_vm5, %v537_v34, 0.0 }
 0x118   : > { %v538_v36 = vsel %vm523_vm5, %v536_v33, 0.0 }
 0x119   : > { %527 = vadd.xlane.f32.xlu0 %v526_v35  ;;  %v540_v38 = vadd.f32 %v539_v37, %v538_v36 }
 0x11d   : > { %541 = vadd.xlane.f32.xlu0 %v540_v38 }
 0x1a6   : > { %v528_v39 = vpop.xlane.xlu0 %527 }
 0x1a7   : > { %v529_v40 = vrot.slane %v528_v39, 4 }
 0x1a9   : > { %v530_v41 = vadd.f32 %v529_v40, %v528_v39 }
 0x1aa   : > { %v542_v42 = vpop.xlane.xlu0 %541 }
 0x1ab   : > { %v531_v43 = vrot.slane %v530_v41, 2  ;;  %v543_v44 = vrot.slane %v542_v42, 4 }
 0x1ad   : > { %v544_v45 = vadd.f32 %v543_v44, %v542_v42  ;;  %v532_v46 = vadd.f32 %v531_v43, %v530_v41 }
 0x1af   : > { %v545_v47 = vrot.slane %v544_v45, 2  ;;  %v533_v48 = vrot.slane %v532_v46, 1 }
 0x1b1   : > { %v546_v49 = vadd.f32 %v545_v47, %v544_v45  ;;  %v534_v50 = vadd.f32 %v533_v48, %v532_v46 }
 0x1b3   : > { %781 = vpush %v534_v50  ;;  %v547_v51 = vrot.slane %v546_v49, 1 }
 0x1b5   : > { %v548_v52 = vadd.f32 %v547_v51, %v546_v49 }
 0x1b7   : > { %783 = vpush %v548_v52 }
 0x1e4   : > { %s782_s15 = spop %781 }
 0x1e5   : > { %v554_v56 = vstv %s782_s15 }
 0x1e8   : > { %s784_s26 = spop %783 }
 0x1e9   : > { %v555_v57 = vstv %s784_s26 }
 0x1ea   : > { %v556_v58 = vsel %vm553_vm6, %v554_v56, %v555_v57 }
 0x1eb   : > { %v557_v59 = vadd.f32 %v556_v58, %v552_v55 }
 0x1ed   : > { %558 = vst [vmem:[%s982_s7] sm:$0x3] %v557_v59 }
 0x1ee PF: > { %s15_s21 = sadd.s32 1, %s896_s21   ;;  %s1050_s5 = sld [smem:[#allocation2_spill]] }
 0x1ef   : > { %p12_p5 = scmp.ge.s32.totalorder %s15_s21, 66   ;;  %s1051_s6 = sld [smem:[#allocation3_spill]] }
 0x1f0   : > { %s1052_s15 = smov %s884_s18  ;;  %s1053_s16 = smov %s888_s19 }
 0x1f1   : > { %s1054_s17 = smov %s892_s20  ;;  %s1055_s18 = smov %s1059_s22 }
 0x1f2   :  { %14 = sbr.rel (!%p12_p5) target bundleno = 4 (0x4), region = 92 }
 0x1f4   : > { %s1056_s19 = smov %s1050_s5 }
 0x1f5   : > { %s1057_s20 = smov %s1051_s6 }

</bundles_post_ra>
